<compile_context>
chip_gen: v7x
topology: tpu7x:2x2x1
jax: 0.10.0
libtpu: 0.0.40
codegen_flags: <defaults>
</compile_context>

<pallas_src>
import math
import functools

import jax
import jax.numpy as jnp
from jax.experimental import pallas as pl
from jax.experimental.pallas import tpu as pltpu


def make_gaussian_kernel_2d(kernel_size: int, sigma: float) -> jnp.ndarray:
    """(K, K) normalized 2-D Gaussian kernel, exactly as built by the PyTorch
    module's __init__ (identical for every channel)."""
    coords = jnp.arange(kernel_size, dtype=jnp.float32)
    mean = (kernel_size - 1) / 2.0
    g = (1.0 / (sigma * math.sqrt(2.0 * math.pi))) * jnp.exp(
        -(((coords - mean) / sigma) ** 2) / 2.0
    )
    k2d = g[:, None] * g[None, :]
    return (k2d / jnp.sum(k2d)).astype(jnp.float32)


def make_conv_matrix(H: int, W: int, k2d: jnp.ndarray, pad: int) -> jnp.ndarray:
    """Banded (H*W, H*W) matrix M with the zero padding baked in, such that
        conv(x)[c, p] = sum_q x[c, q] * M[q, p]
    reproduces F.pad(x, (1,1,1,1)) followed by the depthwise KxK conv."""
    K = int(k2d.shape[0])
    HW = H * W
    ii = jnp.arange(H)
    jj = jnp.arange(W)
    qi = ii[:, None, None, None]          # input row
    qj = jj[None, :, None, None]          # input col
    pi = ii[None, None, :, None]          # output row
    pj = jj[None, None, None, :]          # output col
    di = qi - pi + pad                    # kernel row index
    dj = qj - pj + pad                    # kernel col index
    valid = (di >= 0) & (di < K) & (dj >= 0) & (dj < K)
    vals = jnp.where(
        valid, k2d[jnp.clip(di, 0, K - 1), jnp.clip(dj, 0, K - 1)], 0.0
    )
    return vals.reshape(HW, HW).astype(jnp.float32)


def _smooth_kernel(x_ref, m_ref, o_ref):
    """One grid step = one block of Cb complete channels, spatial dims flattened.

    x_ref : VMEM (1, Cb, HW)      -- input channels, lane-dense
    m_ref : VMEM (HW, HW) f32     -- banded conv matrix, resident across steps
    o_ref : VMEM (1, Cb, HW) f32  -- blurred + L2-normalized channels
    """
    x = x_ref[0].astype(jnp.float32)                       # (Cb, HW)

    # Whole 3x3 depthwise conv (incl. zero halo) as one MXU matmul.
    z = jnp.dot(
        x,
        m_ref[...],
        preferred_element_type=jnp.float32,
        precision=jax.lax.Precision.HIGHEST,
    )                                                      # (Cb, HW)

    # Per-channel L2 normalization: lane reduction + rsqrt + multiply.
    # (rsqrt(0) -> inf matches the reference's divide-by-zero for an
    #  all-zero channel.)
    sumsq = jnp.sum(z * z, axis=1, keepdims=True)          # (Cb, 1)
    o_ref[0] = z * jax.lax.rsqrt(sumsq)


def _vmem_block_budget() -> int:
    """Per-block byte budget, generation-aware.  Working set per grid step is
    roughly 2x input + 2x output pipeline buffers plus the resident conv matrix,
    so these budgets stay well inside the default 32 MiB scoped VMEM on every
    generation (v7x physical VMEM is only 64 MiB)."""
    try:
        vmem = pltpu.get_tpu_info().vmem_capacity_bytes
    except Exception:
        vmem = 64 << 20
    if vmem >= (128 << 20):        # v5e / v6e: 128 MiB VMEM
        return 6 << 20
    return 4 << 20                 # v7x: 64 MiB VMEM


def _pick_channel_block(C: int, HW: int, itemsize: int = 4) -> int:
    """Channels per grid step.  Tiny inputs -> one block (one grid step; no
    pointless splitting on single-TC v5e/v6e or for sub-microsecond work on
    v7x).  Otherwise the largest divisor of C that fits the budget, preferring
    multiples of 8 for full f32 sublane occupancy."""
    budget = _vmem_block_budget()
    if C * HW * itemsize <= budget:
        return C
    divs = [d for d in range(1, C) if C % d == 0 and d * HW * itemsize <= budget]
    mult8 = [d for d in divs if d % 8 == 0]
    if mult8:
        return max(mult8)
    return max(divs) if divs else 1


def gaussian_smoothing_2d(x: jnp.ndarray, k2d: jnp.ndarray) -> jnp.ndarray:
    """x: (C, H, W); k2d: (K, K) normalized Gaussian kernel.
    Returns (C, H, W) float32, matching the PyTorch module's forward."""
    C, H, W = x.shape
    K = int(k2d.shape[-1])
    # The PyTorch module hard-codes F.pad(x, (1,1,1,1)); shape-preserving only
    # for K == 3, so we require it rather than silently diverging.
    assert K == 3, "GaussianSmoothing2D forward is only shape-consistent for kernel_size == 3"
    pad = 1
    HW = H * W

    # The banded conv matrix scales as HW^2; keep this path for small images.
    # TODO(synk): fall back to a separable roll+mask path for very large H*W.
    assert HW * HW * 4 <= (16 << 20), "conv matrix would exceed the VMEM budget"

    cb = _pick_channel_block(C, HW, itemsize=4)
    n_blocks = C // cb

    # Free (contiguous) reshape: flatten spatial dims so every load/store is
    # lane-dense (last dim = H*W, a multiple of 128 here via full-extent block).
    x_resh = x.reshape(n_blocks, cb, HW)
    conv_mat = make_conv_matrix(H, W, k2d, pad)

    out = pl.pallas_call(
        _smooth_kernel,
        out_shape=jax.ShapeDtypeStruct((n_blocks, cb, HW), jnp.float32),
        grid=(n_blocks,),
        in_specs=[
            pl.BlockSpec((1, cb, HW), lambda c: (c, 0, 0)),   # channel block
            pl.BlockSpec((HW, HW), lambda c: (0, 0)),         # resident conv matrix
        ],
        out_specs=pl.BlockSpec((1, cb, HW), lambda c: (c, 0, 0)),
        compiler_params=pltpu.CompilerParams(
            dimension_semantics=("parallel",),
        ),
    )(x_resh, conv_mat)
    return out.reshape(C, H, W)


def _reference(x: jnp.ndarray, k2d: jnp.ndarray) -> jnp.ndarray:
    """Pure-JAX reference mirroring the PyTorch forward (9-tap 2-D conv + L2 norm)."""
    C, H, W = x.shape
    K = int(k2d.shape[-1])
    xpad = jnp.pad(x.astype(jnp.float32), ((0, 0), (1, 1), (1, 1)))
    conv = jnp.zeros((C, H, W), jnp.float32)
    for ki in range(K):
        for kj in range(K):
            conv = conv + k2d[ki, kj] * xpad[:, ki:ki + H, kj:kj + W]
    nrm = jnp.sqrt(jnp.sum(conv.reshape(C, -1) ** 2, axis=1))
    return conv / nrm[:, None, None]


if __name__ == "__main__":
    channels = 4
    kernel_size = 3
    sigma = 1.0
    input_size = 16  # H == W == input_size

    key = jax.random.PRNGKey(0)
    x = jax.random.normal(key, (channels, input_size, input_size), dtype=jnp.float32)

    k2d = make_gaussian_kernel_2d(kernel_size, sigma)

    out = gaussian_smoothing_2d(x, k2d)
    out = jax.block_until_ready(out)

    ref = _reference(x, k2d)
    assert out.shape == (channels, input_size, input_size)
    assert jnp.allclose(out, ref, atol=1e-5, rtol=1e-5)

    print("KERNEL_OK")
</pallas_src>

<mosaic_0001>
module attributes {stable_mosaic.version = 11 : i64} {
  func.func @_smooth_kernel(%arg0: i32, %arg1: memref<1x4x256xf32, #tpu.memory_space<vmem>>, %arg2: memref<256x256xf32, #tpu.memory_space<vmem>>, %arg3: memref<1x4x256xf32, #tpu.memory_space<vmem>>) attributes {dimension_semantics = [#tpu.dimension_semantics<parallel>], iteration_bounds = array<i64: 1>, scalar_prefetch = 0 : i64, scratch_operands = 0 : i64, tpu.core_type = #tpu.core_type<tc>, window_params = [{transform_indices = @transform_0, window_bounds = array<i64: 1, 4, 256>}, {pipeline_mode = #tpu.pipeline_mode<synchronous>, transform_indices = @transform_1, window_bounds = array<i64: 256, 256>}, {transform_indices = @transform_2, window_bounds = array<i64: 1, 4, 256>}]} {
    %c0 = arith.constant 0 : index
    %c0_0 = arith.constant 0 : index
    %c0_1 = arith.constant 0 : index
    %0 = vector.load %arg1[%c0, %c0_0, %c0_1] : memref<1x4x256xf32, #tpu.memory_space<vmem>>, vector<1x4x256xf32>
    %1 = vector.shape_cast %0 : vector<1x4x256xf32> to vector<4x256xf32>
    %c0_2 = arith.constant 0 : index
    %c0_3 = arith.constant 0 : index
    %2 = vector.load %arg2[%c0_2, %c0_3] : memref<256x256xf32, #tpu.memory_space<vmem>>, vector<256x256xf32>
    %cst = arith.constant dense<0.000000e+00> : vector<4x256xf32>
    %3 = tpu.matmul %1, %2, %cst {dimension_numbers = #tpu.dot_dimension_numbers<[1], [0], [0], [1], [0, 0, 1, 1], [], []>, precision = #tpu.contract_precision<fp32>} : vector<4x256xf32>, vector<256x256xf32>, vector<4x256xf32> -> vector<4x256xf32>
    %4 = arith.mulf %3, %3 : vector<4x256xf32>
    %cst_4 = arith.constant dense<0.000000e+00> : vector<4xf32>
    %5 = vector.multi_reduction <add>, %4, %cst_4 [1] : vector<4x256xf32> to vector<4xf32>
    %6 = vector.shape_cast %5 : vector<4xf32> to vector<4x1xf32>
    %7 = math.rsqrt %6 : vector<4x1xf32>
    %8 = vector.broadcast %7 : vector<4x1xf32> to vector<4x256xf32>
    %9 = arith.mulf %3, %8 : vector<4x256xf32>
    %c0_5 = arith.constant 0 : index
    %c0_6 = arith.constant 0 : index
    %c0_7 = arith.constant 0 : index
    %10 = vector.load %arg3[%c0_5, %c0_6, %c0_7] : memref<1x4x256xf32, #tpu.memory_space<vmem>>, vector<1x4x256xf32>
    %11 = vector.shape_cast %10 : vector<1x4x256xf32> to vector<4x256xf32>
    %12 = vector.shape_cast %9 : vector<4x256xf32> to vector<1x4x256xf32>
    tpu.vector_store %arg3[%c0_5, %c0_6, %c0_7], %12 {strides = array<i32>} : memref<1x4x256xf32, #tpu.memory_space<vmem>>, vector<1x4x256xf32>,
    return
  }
  func.func @transform_0(%arg0: i32) -> (i32, i32, i32) {
    %c0_i32 = arith.constant 0 : i32
    %c0_i32_0 = arith.constant 0 : i32
    %c0_i32_1 = arith.constant 0 : i32
    return %arg0, %c0_i32, %c0_i32_0 : i32, i32, i32
  }
  func.func @transform_1(%arg0: i32) -> (i32, i32) {
    %c0_i32 = arith.constant 0 : i32
    %c0_i32_0 = arith.constant 0 : i32
    %c0_i32_1 = arith.constant 0 : i32
    return %c0_i32, %c0_i32_0 : i32, i32
  }
  func.func @transform_2(%arg0: i32) -> (i32, i32, i32) {
    %c0_i32 = arith.constant 0 : i32
    %c0_i32_0 = arith.constant 0 : i32
    %c0_i32_1 = arith.constant 0 : i32
    return %arg0, %c0_i32, %c0_i32_0 : i32, i32, i32
  }
}

</mosaic_0001>

<bundles_post_ra>
// kernel: tpu_custom_call.1
= control target key start
LH: loop header
LB: loop body
LE: loop exit
PB: predicated region body
PF: predicated region fallthrough
CT: control target
= control target key end

     0   :  { %7 = vsyncpa [#allocation3], 0  ;;  %s2692_s0 = inlined_call_operand.hbm [shape: f32[1,4,256], index: 0, kind: input, shape index: {}]   ;;  %s2693_s1 = inlined_call_operand.hbm [shape: f32[256,256], index: 1, kind: input, shape index: {}]   ;;  %s2694_s2 = inlined_call_operand.hbm [shape: f32[1,4,256], index: 2, kind: output, shape index: {}]  }
   0x1   :  { %8 = vsyncpa [#allocation6], 0 }
   0x2   :  { %9 = vsyncpa [#allocation4], 0  ;;  %s1896_s9 = smov [#allocation2]   ;;  %s1897_s11 = smov [#allocation5]  }
   0x3   :  { %s16_s10 = sshll.u32 %s1896_s9, 4  ;;  %s25_s12 = sshll.u32 %s1897_s11, 4  ;;  %s17_s10 = int_to_ptr.vmem [resolvable:$true] %s16_s10  ;;  %s1916_s12 = int_to_ptr.vmem [resolvable:$true] %s25_s12 }
   0x4   :  { %s1824_s15 = scalar_lea.hbm %s2692_s0, 128 }
   0x5   :  { %p1825_p0 = scmp.ne.s32.totalorder %s2692_s0, %s1824_s15  ;;  %p1828_p1 = scmp.lt.u32.totalorder %s1824_s15, %s2692_s0 }
   0x7   :  { %p1830_p2 = pnand %p1828_p1, %p1825_p0 }
   0x9   :  { %1833 = shalt.err (!%p1830_p2)
}
   0xa   :  { %s1834_s20 = scalar_lea.vmem %s17_s10, 128  ;;  %p1839_p4 = scmp.lt.s32.totalorder %s17_s10, %s17_s10 }
   0xb   :  { %p1835_p3 = scmp.ne.s32.totalorder %s17_s10, %s1834_s20  ;;  %p1840_p5 = scmp.lt.s32.totalorder %s1834_s20, %s1834_s20 }
   0xd   :  { %p1841_p6 = por %p1840_p5, %p1839_p4 }
   0xf   :  { %p1842_p7 = pnand %p1841_p6, %p1835_p3 }
  0x11   :  { %1845 = shalt.err (!%p1842_p7)
}
  0x12   :  { %19 = dma.hbm_to_vmem [thread:$0]  %s2692_s0, 128, %s17_s10, [#allocation3]  }
  0x13   :  { %s1846_s25 = scalar_lea.hbm %s2693_s1, 8192 }
  0x14   :  { %p1847_p8 = scmp.ne.s32.totalorder %s2693_s1, %s1846_s25  ;;  %p1850_p9 = scmp.lt.u32.totalorder %s1846_s25, %s2693_s1 }
  0x16   :  { %p1852_p10 = pnand %p1850_p9, %p1847_p8 }
  0x18   :  { %1855 = shalt.err (!%p1852_p10)
}
  0x19   :  { %s1856_s30 = scalar_lea.vmem %s1916_s12, 8192  ;;  %p1861_p12 = scmp.lt.s32.totalorder %s1916_s12, %s1916_s12 }
  0x1a   :  { %p1857_p11 = scmp.ne.s32.totalorder %s1916_s12, %s1856_s30  ;;  %p1862_p13 = scmp.lt.s32.totalorder %s1856_s30, %s1856_s30 }
  0x1c   :  { %p1863_p0 = por %p1862_p13, %p1861_p12 }
  0x1e   :  { %p1864_p1 = pnand %p1863_p0, %p1857_p11 }
  0x20   :  { %1867 = shalt.err (!%p1864_p1)
}
  0x21   :  { %s1898_s0 = smov 256   ;;  %s1899_s3 = smov 16  }
  0x22   :  { %31 = dma.hbm_to_vmem [thread:$0]  %s2693_s1, 8192, %s1916_s12, [#allocation6], %s1898_s0, %s1898_s0, %s1899_s3  }
  0x23   :  { %1890 = dma.done.wait [#allocation3], 128  }
  0x24   :  { %1891 = vsyncadd [#allocation3], 4294967168 }
  0x25   :  { %1892 = dma.done.wait [#allocation6], 8192  }
  0x26   :  { %1893 = vsyncadd [#allocation6], 4294959104  ;;  %v40_v0 = vld [vmem:[#allocation5 + $0x8] sm:$0xff]  ;;  %v42_v1 = vld [vmem:[#allocation5 + $0x18] sm:$0xff]  ;;  %vm1392_vm0 = vcmask 1043456   ;;  %s1900_s1 = smov [#allocation7]  }
  0x27   :  { %v39_v2 = vld [vmem:[#allocation5] sm:$0xff]  ;;  %v106_v3 = vand.u32 4294901760, %v40_v0  ;;  %v110_v4 = vand.u32 4294901760, %v42_v1  ;;  %v41_v5 = vld [vmem:[#allocation5 + $0x10] sm:$0xff]  ;;  %v44_v7 = vld [vmem:[#allocation5 + $0x28] sm:$0xff]  ;;  %s1412_s6 = sshll.u32 %s1900_s1, 4  ;;  %s1413_s6 = int_to_ptr.vmem [resolvable:$true] %s1412_s6 }
  0x28   :  { %v108_v6 = vand.u32 4294901760, %v39_v2  ;;  %v46_v8 = vld [vmem:[#allocation5 + $0x38] sm:$0xff]  ;;  %v112_v9 = vand.u32 4294901760, %v41_v5  ;;  %v114_v10 = vand.u32 4294901760, %v44_v7  ;;  %v43_v12 = vld [vmem:[#allocation5 + $0x20] sm:$0xff]  ;;  %v45_v13 = vld [vmem:[#allocation5 + $0x30] sm:$0xff]  ;;  %p1873_p3 = scmp.lt.s32.totalorder %s1413_s6, %s1413_s6 }
  0x29   :  { %v118_v11 = vand.u32 4294901760, %v46_v8  ;;  %v48_v14 = vld [vmem:[#allocation5 + $0x48] sm:$0xff]  ;;  %v1947_v15 = vpack.c.bf16 %v110_v4, %v106_v3  ;;  %v1949_v16 = vld [vmem:[#allocation5 + $0x58] sm:$0xff]  ;;  %v1951_v17 = vld [vmem:[#allocation5 + $0x40] sm:$0xff]  ;;  %v116_v23 = vand.u32 4294901760, %v43_v12  ;;  %v120_v24 = vand.u32 4294901760, %v45_v13 }
  0x2a   :  { %v1953_v18 = vld [vmem:[#allocation5 + $0x50] sm:$0xff]  ;;  %v1955_v19 = vpack.c.bf16 %v112_v9, %v108_v6  ;;  %v52_v21 = vld [vmem:[#allocation5 + $0x68] sm:$0xff]  ;;  %v54_v22 = vld [vmem:[#allocation5 + $0x78] sm:$0xff]  ;;  %v122_v25 = vand.u32 4294901760, %v48_v14  ;;  %v126_v26 = vand.u32 4294901760, %v1949_v16  ;;  %v124_v27 = vand.u32 4294901760, %v1951_v17 }
  0x2b   :  { %2842 = vst [vmem:[#allocation11_spill] sm:$0xff] %v1947_v15  ;;  %v1957_v20 = vpack.c.bf16 %v118_v11, %v114_v10  ;;  %1423 = vmatprep.subr.bf16.mxu1 %v1947_v15  ;;  %1615 = vmatprep.subr.bf16.mxu0 %v1947_v15  ;;  %v128_v28 = vand.u32 4294901760, %v1953_v18  ;;  %v1968_v29 = vpack.c.bf16 %v120_v24, %v116_v23  ;;  %v130_v30 = vand.u32 4294901760, %v52_v21  ;;  %v51_v32 = vld [vmem:[#allocation5 + $0x60] sm:$0xff]  ;;  %v53_v33 = vld [vmem:[#allocation5 + $0x70] sm:$0xff]  ;;  %v56_v35 = vld [vmem:[#allocation5 + $0x88] sm:$0xff] }
  0x2c   :  { %2843 = vst [vmem:[#allocation12_spill] sm:$0xff] %v1955_v19  ;;  %1425 = vmatpush1.bf16.msra.mxu1 %v1955_v19  ;;  %1617 = vmatpush1.bf16.msra.mxu0 %v1955_v19  ;;  %v134_v31 = vand.u32 4294901760, %v54_v22  ;;  %v1970_v34 = vpack.c.bf16 %v126_v26, %v122_v25  ;;  %v58_v36 = vld [vmem:[#allocation5 + $0x98] sm:$0xff]  ;;  %v132_v38 = vand.u32 4294901760, %v51_v32  ;;  %v136_v39 = vand.u32 4294901760, %v53_v33  ;;  %v55_v43 = vld [vmem:[#allocation5 + $0x80] sm:$0xff] }
  0x2d   :  { %2844 = vst [vmem:[#allocation13_spill] sm:$0xff] %v1957_v20  ;;  %1427 = vmatprep.subr.bf16.mxu1 %v1957_v20  ;;  %1619 = vmatprep.subr.bf16.mxu0 %v1957_v20  ;;  %2845 = vst [vmem:[#allocation14_spill] sm:$0xff] %v1968_v29  ;;  %v1974_v37 = vpack.c.bf16 %v128_v28, %v124_v27  ;;  %v138_v41 = vand.u32 4294901760, %v56_v35  ;;  %v142_v42 = vand.u32 4294901760, %v58_v36  ;;  %v57_v44 = vld [vmem:[#allocation5 + $0x90] sm:$0xff]  ;;  %v60_v48 = vld [vmem:[#allocation5 + $0xa8] sm:$0xff] }
  0x2e   :  { %2846 = vst [vmem:[#allocation15_spill] sm:$0xff] %v1970_v34  ;;  %v1978_v40 = vpack.c.bf16 %v134_v31, %v130_v30  ;;  %v1980_v45 = vsub.f32 %v40_v0, %v106_v3  ;;  %v1982_v46 = vsub.f32 %v42_v1, %v110_v4  ;;  %v1984_v47 = vsub.f32 %v39_v2, %v108_v6  ;;  %v62_v49 = vld [vmem:[#allocation5 + $0xb8] sm:$0xff]  ;;  %v59_v58 = vld [vmem:[#allocation5 + $0xa0] sm:$0xff]  ;;  %v61_v59 = vld [vmem:[#allocation5 + $0xb0] sm:$0xff]  ;;  %s1868_s7 = scalar_lea.vmem %s1413_s6, 128 }
  0x2f   :  { %2847 = vst [vmem:[#allocation16_spill] sm:$0xff] %v1974_v37  ;;  %v1986_v50 = vsub.f32 %v41_v5, %v112_v9  ;;  %v1988_v51 = vsub.f32 %v44_v7, %v114_v10  ;;  %v1990_v52 = vsub.f32 %v46_v8, %v118_v11  ;;  %v1992_v53 = vsub.f32 %v43_v12, %v116_v23  ;;  %v64_v0 = vld [vmem:[#allocation5 + $0xc8] sm:$0xff]  ;;  %v66_v1 = vld [vmem:[#allocation5 + $0xd8] sm:$0xff]  ;;  %v63_v10 = vld [vmem:[#allocation5 + $0xc0] sm:$0xff]  ;;  %p1869_p2 = scmp.ne.s32.totalorder %s1413_s6, %s1868_s7  ;;  %p1874_p4 = scmp.lt.s32.totalorder %s1868_s7, %s1868_s7 }
  0x30   :  { %1429 = vmatpush1.bf16.msra.mxu1 %v1968_v29  ;;  %1621 = vmatpush1.bf16.msra.mxu0 %v1968_v29  ;;  %2848 = vst [vmem:[#allocation17_spill] sm:$0xff] %v1978_v40  ;;  %2849 = vst [vmem:[#allocation18_spill] sm:$0xff] %v1980_v45  ;;  %v1994_v54 = vsub.f32 %v45_v13, %v120_v24  ;;  %v1998_v55 = vpack.c.bf16 %v136_v39, %v132_v38  ;;  %v140_v56 = vand.u32 4294901760, %v55_v43  ;;  %v65_v11 = vld [vmem:[#allocation5 + $0xd0] sm:$0xff]  ;;  %v70_v23 = vld [vmem:[#allocation5 + $0xf8] sm:$0xff] }
  0x31   :  { %1431 = vmatprep.subr.bf16.mxu1 %v1970_v34  ;;  %1623 = vmatprep.subr.bf16.mxu0 %v1970_v34  ;;  %2850 = vst [vmem:[#allocation19_spill] sm:$0xff] %v1982_v46  ;;  %2851 = vst [vmem:[#allocation20_spill] sm:$0xff] %v1984_v47  ;;  %v144_v57 = vand.u32 4294901760, %v57_v44  ;;  %v2000_v60 = vsub.f32 %v48_v14, %v122_v25  ;;  %v2004_v61 = vpack.c.bf16 %v142_v42, %v138_v41  ;;  %v82_v34 = vld [vmem:[#allocation5 + $0x158] sm:$0xff]  ;;  %v79_v20 = vld [vmem:[#allocation5 + $0x140] sm:$0xff]  ;;  %p1875_p5 = por %p1874_p4, %p1873_p3 }
  0x32   :  { %2852 = vst [vmem:[#allocation21_spill] sm:$0xff] %v1986_v50  ;;  %2853 = vst [vmem:[#allocation22_spill] sm:$0xff] %v1988_v51  ;;  %v146_v62 = vand.u32 4294901760, %v60_v48  ;;  %v150_v63 = vand.u32 4294901760, %v62_v49  ;;  %v2007_v2 = vsub.f32 %v1949_v16, %v126_v26  ;;  %v2010_v3 = vsub.f32 %v1951_v17, %v124_v27 }
  0x33   :  { %2854 = vst [vmem:[#allocation23_spill] sm:$0xff] %v1990_v52  ;;  %2855 = vst [vmem:[#allocation24_spill] sm:$0xff] %v1998_v55  ;;  %v2013_v4 = vsub.f32 %v1953_v18, %v128_v28  ;;  %v2015_v5 = vsub.f32 %v52_v21, %v130_v30  ;;  %v2017_v6 = vsub.f32 %v54_v22, %v134_v31  ;;  %v148_v8 = vand.u32 4294901760, %v59_v58  ;;  %v68_v22 = vld [vmem:[#allocation5 + $0xe8] sm:$0xff]  ;;  %v67_v28 = vld [vmem:[#allocation5 + $0xe0] sm:$0xff]  ;;  %p1876_p6 = pnand %p1875_p5, %p1869_p2 }
  0x34   :  { %1433 = vmatpush1.bf16.msra.mxu1 %v1974_v37  ;;  %1625 = vmatpush1.bf16.msra.mxu0 %v1974_v37  ;;  %2856 = vst [vmem:[#allocation25_spill] sm:$0xff] %v2000_v60  ;;  %2857 = vst [vmem:[#allocation26_spill] sm:$0xff] %v2004_v61  ;;  %v2019_v7 = vsub.f32 %v51_v32, %v132_v38  ;;  %v152_v9 = vand.u32 4294901760, %v61_v59  ;;  %v2022_v12 = vsub.f32 %v53_v33, %v136_v39  ;;  %v69_v30 = vld [vmem:[#allocation5 + $0xf0] sm:$0xff]  ;;  %v74_v38 = vld [vmem:[#allocation5 + $0x118] sm:$0xff] }
  0x35   :  { %1435 = vmatprep.subr.bf16.mxu1 %v1978_v40  ;;  %1627 = vmatprep.subr.bf16.mxu0 %v1978_v40  ;;  %2858 = vst [vmem:[#allocation27_spill] sm:$0xff] %v2010_v3  ;;  %2859 = vst [vmem:[#allocation28_spill] sm:$0xff] %v2013_v4  ;;  %v2025_v13 = vpack.c.bf16 %v144_v57, %v140_v56  ;;  %v154_v14 = vand.u32 4294901760, %v64_v0  ;;  %v158_v16 = vand.u32 4294901760, %v66_v1  ;;  %v156_v26 = vand.u32 4294901760, %v63_v10 }
  0x36   :  { %2860 = vst [vmem:[#allocation29_spill] sm:$0xff] %v2015_v5  ;;  %2861 = vst [vmem:[#allocation30_spill] sm:$0xff] %v2017_v6  ;;  %v2028_v17 = vsub.f32 %v56_v35, %v138_v41  ;;  %v2030_v18 = vsub.f32 %v58_v36, %v142_v42  ;;  %v2033_v21 = vpack.c.bf16 %v150_v63, %v146_v62  ;;  %v160_v27 = vand.u32 4294901760, %v65_v11  ;;  %v72_v36 = vld [vmem:[#allocation5 + $0x108] sm:$0xff] }
  0x37   :  { %2862 = vst [vmem:[#allocation31_spill] sm:$0xff] %v2019_v7  ;;  %2863 = vst [vmem:[#allocation32_spill] sm:$0xff] %v2022_v12  ;;  %v2035_v24 = vsub.f32 %v55_v43, %v140_v56  ;;  %v2037_v25 = vsub.f32 %v57_v44, %v144_v57  ;;  %v2039_v31 = vsub.f32 %v60_v48, %v146_v62  ;;  %v162_v42 = vand.u32 4294901760, %v68_v22  ;;  %v71_v44 = vld [vmem:[#allocation5 + $0x100] sm:$0xff]  ;;  %v73_v48 = vld [vmem:[#allocation5 + $0x110] sm:$0xff] }
  0x38   :  { %1437 = vmatpush1.bf16.msra.mxu1 %v1998_v55  ;;  %1629 = vmatpush1.bf16.msra.mxu0 %v1998_v55  ;;  %2864 = vst [vmem:[#allocation33_spill] sm:$0xff] %v2025_v13  ;;  %2865 = vst [vmem:[#allocation34_spill] sm:$0xff] %v2028_v17  ;;  %v2041_v32 = vsub.f32 %v62_v49, %v150_v63  ;;  %v2043_v33 = vpack.c.bf16 %v152_v9, %v148_v8  ;;  %v166_v43 = vand.u32 4294901760, %v70_v23  ;;  %v76_v62 = vld [vmem:[#allocation5 + $0x128] sm:$0xff]  ;;  %v78_v63 = vld [vmem:[#allocation5 + $0x138] sm:$0xff] }
  0x39   :  { %1439 = vmatprep.subr.bf16.mxu1 %v2004_v61  ;;  %2866 = vst [vmem:[#allocation35_spill] sm:$0xff] %v2030_v18  ;;  %1631 = vmatprep.subr.bf16.mxu0 %v2004_v61  ;;  %2867 = vst [vmem:[#allocation36_spill] sm:$0xff] %v2033_v21  ;;  %v2045_v35 = vsub.f32 %v59_v58, %v148_v8  ;;  %v2049_v39 = vsub.f32 %v61_v59, %v152_v9  ;;  %v164_v57 = vand.u32 4294901760, %v67_v28  ;;  %v75_v61 = vld [vmem:[#allocation5 + $0x120] sm:$0xff]  ;;  %v77_v55 = vld [vmem:[#allocation5 + $0x130] sm:$0xff] }
  0x3a   :  { %2868 = vst [vmem:[#allocation37_spill] sm:$0xff] %v2035_v24  ;;  %2869 = vst [vmem:[#allocation38_spill] sm:$0xff] %v2037_v25  ;;  %v2051_v41 = vpack.c.bf16 %v158_v16, %v154_v14  ;;  %v2055_v49 = vsub.f32 %v64_v0, %v154_v14  ;;  %v2057_v56 = vsub.f32 %v66_v1, %v158_v16  ;;  %v168_v58 = vand.u32 4294901760, %v69_v30 }
  0x3b   :  { %2870 = vst [vmem:[#allocation39_spill] sm:$0xff] %v2039_v31  ;;  %2871 = vst [vmem:[#allocation40_spill] sm:$0xff] %v2041_v32  ;;  %v2059_v59 = vpack.c.bf16 %v160_v27, %v156_v26  ;;  %v2061_v8 = vsub.f32 %v63_v10, %v156_v26  ;;  %v170_v9 = vand.u32 4294901760, %v72_v36  ;;  %v2063_v40 = vsub.f32 %v65_v11, %v160_v27 }
  0x3c   :  { %2872 = vst [vmem:[#allocation41_spill] sm:$0xff] %v2043_v33  ;;  %2873 = vst [vmem:[#allocation42_spill] sm:$0xff] %v2045_v35  ;;  %1441 = vmatpush1.bf16.msra.mxu1 %v2025_v13  ;;  %1633 = vmatpush1.bf16.msra.mxu0 %v2025_v13  ;;  %v174_v13 = vand.u32 4294901760, %v74_v38  ;;  %v2065_v37 = vsub.f32 %v68_v22, %v162_v42  ;;  %v172_v0 = vand.u32 4294901760, %v71_v44  ;;  %v176_v14 = vand.u32 4294901760, %v73_v48 }
  0x3d   :  { %2874 = vst [vmem:[#allocation43_spill] sm:$0xff] %v2049_v39  ;;  %2875 = vst [vmem:[#allocation44_spill] sm:$0xff] %v2051_v41  ;;  %1443 = vmatprep.subr.bf16.mxu1 %v2033_v21  ;;  %1635 = vmatprep.subr.bf16.mxu0 %v2033_v21  ;;  %v2069_v1 = vpack.c.bf16 %v166_v43, %v162_v42  ;;  %v2071_v16 = vsub.f32 %v70_v23, %v166_v43  ;;  %v178_v10 = vand.u32 4294901760, %v76_v62  ;;  %v80_v21 = vld [vmem:[#allocation5 + $0x148] sm:$0xff] }
  0x3e   :  { %2876 = vst [vmem:[#allocation45_spill] sm:$0xff] %v2055_v49  ;;  %2877 = vst [vmem:[#allocation46_spill] sm:$0xff] %v2057_v56  ;;  %v182_v26 = vand.u32 4294901760, %v78_v63  ;;  %v2075_v11 = vpack.c.bf16 %v168_v58, %v164_v57  ;;  %v2077_v22 = vsub.f32 %v67_v28, %v164_v57  ;;  %v180_v27 = vand.u32 4294901760, %v75_v61  ;;  %v84_v28 = vld [vmem:[#allocation5 + $0x168] sm:$0xff]  ;;  %v86_v57 = vld [vmem:[#allocation5 + $0x178] sm:$0xff] }
  0x3f   :  { %2878 = vst [vmem:[#allocation47_spill] sm:$0xff] %v2059_v59  ;;  %2879 = vst [vmem:[#allocation48_spill] sm:$0xff] %v2061_v8  ;;  %v184_v29 = vand.u32 4294901760, %v77_v55  ;;  %v2079_v42 = vsub.f32 %v69_v30, %v168_v58  ;;  %v2081_v23 = vpack.c.bf16 %v174_v13, %v170_v9  ;;  %v2083_v43 = vsub.f32 %v72_v36, %v170_v9 }
  0x40   :  { %2880 = vst [vmem:[#allocation49_spill] sm:$0xff] %v2063_v40  ;;  %2881 = vst [vmem:[#allocation50_spill] sm:$0xff] %v2065_v37  ;;  %1445 = vmatpush1.bf16.msra.mxu1 %v2043_v33  ;;  %1637 = vmatpush1.bf16.msra.mxu0 %v2043_v33  ;;  %v81_v33 = vld [vmem:[#allocation5 + $0x150] sm:$0xff]  ;;  %v2085_v19 = vsub.f32 %v74_v38, %v174_v13  ;;  %v2087_v15 = vpack.c.bf16 %v176_v14, %v172_v0  ;;  %v190_v37 = vand.u32 4294901760, %v82_v34  ;;  %v83_v13 = vld [vmem:[#allocation5 + $0x160] sm:$0xff] }
  0x41   :  { %2882 = vst [vmem:[#allocation51_spill] sm:$0xff] %v2069_v1  ;;  %2883 = vst [vmem:[#allocation52_spill] sm:$0xff] %v2071_v16  ;;  %1447 = vmatprep.subr.bf16.mxu1 %v2051_v41  ;;  %1639 = vmatprep.subr.bf16.mxu0 %v2051_v41  ;;  %v2089_v16 = vsub.f32 %v71_v44, %v172_v0  ;;  %v186_v41 = vand.u32 4294901760, %v80_v21  ;;  %v2093_v30 = vsub.f32 %v73_v48, %v176_v14  ;;  %v85_v38 = vld [vmem:[#allocation5 + $0x170] sm:$0xff] }
  0x42   :  { %2884 = vst [vmem:[#allocation53_spill] sm:$0xff] %v2075_v11  ;;  %2885 = vst [vmem:[#allocation54_spill] sm:$0xff] %v2077_v22  ;;  %v2095_v58 = vpack.c.bf16 %v182_v26, %v178_v10  ;;  %v188_v36 = vand.u32 4294901760, %v79_v20  ;;  %v192_v9 = vand.u32 4294901760, %v81_v33  ;;  %v2099_v44 = vsub.f32 %v76_v62, %v178_v10  ;;  %v89_v22 = vld [vmem:[#allocation5 + $0x190] sm:$0xff] }
  0x43   :  { %2886 = vst [vmem:[#allocation55_spill] sm:$0xff] %v2079_v42  ;;  %2887 = vst [vmem:[#allocation56_spill] sm:$0xff] %v2081_v23  ;;  %v2101_v0 = vsub.f32 %v78_v63, %v182_v26  ;;  %v2105_v48 = vsub.f32 %v75_v61, %v180_v27  ;;  %v2107_v14 = vsub.f32 %v77_v55, %v184_v29  ;;  %v87_v42 = vld [vmem:[#allocation5 + $0x180] sm:$0xff]  ;;  %v196_v62 = vand.u32 4294901760, %v83_v13  ;;  %v92_v63 = vld [vmem:[#allocation5 + $0x1a8] sm:$0xff] }
  0x44   :  { %2888 = vst [vmem:[#allocation57_spill] sm:$0xff] %v2083_v43  ;;  %2889 = vst [vmem:[#allocation58_spill] sm:$0xff] %v2085_v19  ;;  %1449 = vmatpush1.bf16.msra.mxu1 %v2059_v59  ;;  %1641 = vmatpush1.bf16.msra.mxu0 %v2059_v59  ;;  %v88_v19 = vld [vmem:[#allocation5 + $0x188] sm:$0xff]  ;;  %v90_v59 = vld [vmem:[#allocation5 + $0x198] sm:$0xff]  ;;  %v198_v43 = vand.u32 4294901760, %v86_v57  ;;  %v2109_v40 = vpack.c.bf16 %v190_v37, %v186_v41  ;;  %v2111_v8 = vsub.f32 %v80_v21, %v186_v41 }
  0x45   :  { %2890 = vst [vmem:[#allocation59_spill] sm:$0xff] %v2087_v15  ;;  %2891 = vst [vmem:[#allocation60_spill] sm:$0xff] %v2089_v16  ;;  %1451 = vmatprep.subr.bf16.mxu1 %v2069_v1  ;;  %1643 = vmatprep.subr.bf16.mxu0 %v2069_v1  ;;  %v2103_v16 = vpack.c.bf16 %v184_v29, %v180_v27  ;;  %v200_v10 = vand.u32 4294901760, %v85_v38  ;;  %v94_v26 = vld [vmem:[#allocation5 + $0x1b8] sm:$0xff]  ;;  %v2115_v61 = vsub.f32 %v82_v34, %v190_v37 }
  0x46   :  { %2892 = vst [vmem:[#allocation61_spill] sm:$0xff] %v2093_v30  ;;  %2893 = vst [vmem:[#allocation62_spill] sm:$0xff] %v2095_v58  ;;  %v194_v30 = vand.u32 4294901760, %v84_v28  ;;  %v2117_v29 = vpack.c.bf16 %v192_v9, %v188_v36  ;;  %v202_v55 = vand.u32 4294901760, %v88_v19  ;;  %v206_v27 = vand.u32 4294901760, %v90_v59 }
  0x47   :  { %2894 = vst [vmem:[#allocation63_spill] sm:$0xff] %v2099_v44  ;;  %2895 = vst [vmem:[#allocation64_spill] sm:$0xff] %v2101_v0  ;;  %v2121_v21 = vsub.f32 %v79_v20, %v188_v36  ;;  %v2123_v41 = vsub.f32 %v81_v33, %v192_v9  ;;  %v204_v1 = vand.u32 4294901760, %v87_v42  ;;  %v210_v37 = vand.u32 4294901760, %v92_v63  ;;  %v98_v44 = vld [vmem:[#allocation5 + $0x1d8] sm:$0xff] }
  0x48   :  { %2896 = vst [vmem:[#allocation65_spill] sm:$0xff] %v2103_v16  ;;  %2897 = vst [vmem:[#allocation66_spill] sm:$0xff] %v2105_v48  ;;  %1453 = vmatpush1.bf16.msra.mxu1 %v2075_v11  ;;  %1645 = vmatpush1.bf16.msra.mxu0 %v2075_v11  ;;  %v93_v48 = vld [vmem:[#allocation5 + $0x1b0] sm:$0xff]  ;;  %v2125_v0 = vpack.c.bf16 %v198_v43, %v194_v30  ;;  %v2127_v34 = vsub.f32 %v84_v28, %v194_v30  ;;  %v214_v11 = vand.u32 4294901760, %v94_v26  ;;  %v38_v36 = vld [vmem:[#allocation2] sm:$0xff] }
  0x49   :  { %2898 = vst [vmem:[#allocation67_spill] sm:$0xff] %v2107_v14  ;;  %2899 = vst [vmem:[#allocation68_spill] sm:$0xff] %v2109_v40  ;;  %1455 = vmatprep.subr.bf16.mxu1 %v2081_v23  ;;  %1647 = vmatprep.subr.bf16.mxu0 %v2081_v23  ;;  %v91_v14 = vld [vmem:[#allocation5 + $0x1a0] sm:$0xff]  ;;  %v2129_v56 = vsub.f32 %v86_v57, %v198_v43  ;;  %v2131_v49 = vpack.c.bf16 %v200_v10, %v196_v62  ;;  %v216_v23 = vand.u32 4294901760, %v93_v48  ;;  %v97_v43 = vld [vmem:[#allocation5 + $0x1d0] sm:$0xff] }
  0x4a   :  { %2900 = vst [vmem:[#allocation69_spill] sm:$0xff] %v2111_v8  ;;  %2901 = vst [vmem:[#allocation70_spill] sm:$0xff] %v2115_v61  ;;  %v208_v8 = vand.u32 4294901760, %v89_v22  ;;  %v96_v61 = vld [vmem:[#allocation5 + $0x1c8] sm:$0xff]  ;;  %v2133_v20 = vsub.f32 %v83_v13, %v196_v62  ;;  %v2135_v33 = vsub.f32 %v85_v38, %v200_v10  ;;  %v2139_v9 = vpack.c.bf16 %v206_v27, %v202_v55 }
  0x4b   :  { %2902 = vst [vmem:[#allocation71_spill] sm:$0xff] %v2117_v29  ;;  %2903 = vst [vmem:[#allocation72_spill] sm:$0xff] %v2121_v21  ;;  %v2141_v28 = vsub.f32 %v88_v19, %v202_v55  ;;  %v212_v30 = vand.u32 4294901760, %v91_v14  ;;  %v2145_v57 = vsub.f32 %v90_v59, %v206_v27  ;;  %v218_v38 = vand.u32 4294901760, %v96_v61  ;;  %v100_v55 = vld [vmem:[#allocation5 + $0x1e8] sm:$0xff] }
  0x4c   :  { %2904 = vst [vmem:[#allocation73_spill] sm:$0xff] %v2123_v41  ;;  %2905 = vst [vmem:[#allocation74_spill] sm:$0xff] %v2125_v0  ;;  %1457 = vmatpush1.bf16.msra.mxu1 %v2087_v15  ;;  %1649 = vmatpush1.bf16.msra.mxu0 %v2087_v15  ;;  %v2147_v13 = vpack.c.bf16 %v208_v8, %v204_v1  ;;  %v222_v62 = vand.u32 4294901760, %v98_v44  ;;  %v2149_v10 = vsub.f32 %v87_v42, %v204_v1 }
  0x4d   :  { %2906 = vst [vmem:[#allocation75_spill] sm:$0xff] %v2127_v34  ;;  %2907 = vst [vmem:[#allocation76_spill] sm:$0xff] %v2129_v56  ;;  %v95_v34 = vld [vmem:[#allocation5 + $0x1c0] sm:$0xff]  ;;  %1459 = vmatprep.subr.bf16.mxu1 %v2095_v58  ;;  %1651 = vmatprep.subr.bf16.mxu0 %v2095_v58  ;;  %v2151_v15 = vsub.f32 %v89_v22, %v208_v8  ;;  %v2153_v19 = vpack.c.bf16 %v214_v11, %v210_v37  ;;  %v224_v58 = vand.u32 4294901760, %v97_v43  ;;  %v102_v22 = vld [vmem:[#allocation5 + $0x1f8] sm:$0xff] }
  0x4e   :  { %2908 = vst [vmem:[#allocation77_spill] sm:$0xff] %v2131_v49  ;;  %2909 = vst [vmem:[#allocation78_spill] sm:$0xff] %v2133_v20  ;;  %v2157_v20 = vsub.f32 %v94_v26, %v214_v11  ;;  %v220_v56 = vand.u32 4294901760, %v95_v34  ;;  %v2161_v59 = vpack.c.bf16 %v216_v23, %v212_v30  ;;  %v2163_v1 = vsub.f32 %v91_v14, %v212_v30 }
  0x4f   :  { %2910 = vst [vmem:[#allocation79_spill] sm:$0xff] %v2135_v33  ;;  %2911 = vst [vmem:[#allocation80_spill] sm:$0xff] %v2139_v9  ;;  %v2155_v33 = vsub.f32 %v92_v63, %v210_v37  ;;  %v2165_v8 = vsub.f32 %v93_v48, %v216_v23  ;;  %v2171_v11 = vpack.c.bf16 %v222_v62, %v218_v38  ;;  %v226_v26 = vand.u32 4294901760, %v100_v55 }
  0x50   :  { %2912 = vst [vmem:[#allocation81_spill] sm:$0xff] %v2141_v28  ;;  %2913 = vst [vmem:[#allocation82_spill] sm:$0xff] %v2147_v13  ;;  %v104_v28 = vcombine.high %v38_v36, %v38_v36  ;;  %1461 = vmatpush1.bf16.msra.mxu1 %v2103_v16  ;;  %1653 = vmatpush1.bf16.msra.mxu0 %v2103_v16  ;;  %v2173_v63 = vsub.f32 %v96_v61, %v218_v38  ;;  %v253_v27 = vand.u32 4294901760, %v1980_v45 }
  0x51   :  { %2914 = vst [vmem:[#allocation83_spill] sm:$0xff] %v2149_v10  ;;  %2915 = vst [vmem:[#allocation84_spill] sm:$0xff] %v2151_v15  ;;  %1463 = vmatprep.subr.bf16.mxu1 %v2109_v40  ;;  %1655 = vmatprep.subr.bf16.mxu0 %v2109_v40  ;;  %v2176_v37 = vsub.f32 %v98_v44, %v222_v62  ;;  %v2181_v23 = vand.u32 4294901760, %v38_v36  ;;  %v265_v48 = vand.u32 4294901760, %v1982_v46  ;;  %v230_v16 = vand.u32 4294901760, %v102_v22 }
  0x52   :  { %2916 = vst [vmem:[#allocation85_spill] sm:$0xff] %v2153_v19  ;;  %2917 = vst [vmem:[#allocation86_spill] sm:$0xff] %v2155_v33  ;;  %v2167_v42 = vand.u32 4294901760, %v104_v28  ;;  %v2184_v30 = vpack.c.bf16 %v224_v58, %v220_v56  ;;  %v259_v40 = vand.u32 4294901760, %v1984_v47  ;;  %v271_v61 = vand.u32 4294901760, %v1986_v50 }
  0x53   :  { %2918 = vst [vmem:[#allocation87_spill] sm:$0xff] %v2157_v20  ;;  %2919 = vst [vmem:[#allocation88_spill] sm:$0xff] %v2161_v59  ;;  %v2190_v44 = vsub.f32 %v95_v34, %v220_v56  ;;  %v2192_v38 = vsub.f32 %v97_v43, %v224_v58  ;;  %v283_v56 = vand.u32 4294901760, %v1992_v53  ;;  %v266_v34 = vsub.f32 %v1982_v46, %v265_v48 }
  0x54   :  { %2920 = vst [vmem:[#allocation89_spill] sm:$0xff] %v2163_v1  ;;  %2921 = vst [vmem:[#allocation90_spill] sm:$0xff] %v2165_v8  ;;  %v2179_v14 = vsub.f32 %v104_v28, %v2167_v42  ;;  %1465 = vmatpush1.bf16.msra.mxu1 %v2117_v29  ;;  %1657 = vmatpush1.bf16.msra.mxu0 %v2117_v29  ;;  %v99_v28 = vld [vmem:[#allocation5 + $0x1e0] sm:$0xff]  ;;  %v101_v8 = vld [vmem:[#allocation5 + $0x1f0] sm:$0xff]  ;;  %v254_v1 = vsub.f32 %v1980_v45, %v253_v27  ;;  %v289_v29 = vand.u32 4294901760, %v1990_v52 }
  0x55   :  { %2922 = vst [vmem:[#allocation91_spill] sm:$0xff] %v2167_v42  ;;  %2923 = vst [vmem:[#allocation92_spill] sm:$0xff] %v2171_v11  ;;  %1467 = vmatprep.subr.bf16.mxu1 %v2125_v0  ;;  %1659 = vmatprep.subr.bf16.mxu0 %v2125_v0  ;;  %v2206_v43 = vsub.f32 %v38_v36, %v2181_v23  ;;  %v2209_v0 = vpack.c.bf16 %v230_v16, %v226_v26  ;;  %v267_v46 = vand.u32 4294901760, %v266_v34 }
  0x56   :  { %2924 = vst [vmem:[#allocation93_spill] sm:$0xff] %v2173_v63  ;;  %2925 = vst [vmem:[#allocation94_spill] sm:$0xff] %v2176_v37  ;;  %v236_v62 = vand.u32 4294901760, %v2179_v14  ;;  %v277_v37 = vand.u32 4294901760, %v1988_v51  ;;  %v2198_v63 = vsub.f32 %v100_v55, %v226_v26  ;;  %v228_v55 = vand.u32 4294901760, %v99_v28 }
  0x57   :  { %2926 = vst [vmem:[#allocation95_spill] sm:$0xff] %v2179_v14  ;;  %2927 = vst [vmem:[#allocation96_spill] sm:$0xff] %v2181_v23  ;;  %v272_v45 = vsub.f32 %v1986_v50, %v271_v61  ;;  %v290_v36 = vsub.f32 %v1990_v52, %v289_v29  ;;  %v2219_v26 = vsub.f32 %v102_v22, %v230_v16  ;;  %v301_v52 = vand.u32 4294901760, %v2000_v60 }
  0x58   :  { %2928 = vst [vmem:[#allocation97_spill] sm:$0xff] %v2184_v30  ;;  %2929 = vst [vmem:[#allocation98_spill] sm:$0xff] %v2190_v44  ;;  %v237_v58 = vsub.f32 %v2179_v14, %v236_v62  ;;  %978 = vmatprep.mubr.f32.mxu0 %v236_v62  ;;  %1469 = vmatpush1.bf16.msra.mxu1 %v2131_v49  ;;  %v232_v14 = vand.u32 4294901760, %v101_v8  ;;  %v278_v62 = vsub.f32 %v1988_v51, %v277_v37 }
  0x59   :  { %2930 = vst [vmem:[#allocation99_spill] sm:$0xff] %v2192_v38  ;;  %2931 = vst [vmem:[#allocation100_spill] sm:$0xff] %v2198_v63  ;;  %v295_v38 = vand.u32 4294901760, %v1994_v54  ;;  %v260_v63 = vsub.f32 %v1984_v47, %v259_v40  ;;  %1661 = vmatpush1.bf16.msra.mxu0 %v2131_v49  ;;  %1471 = vmatprep.subr.bf16.mxu1 %v2139_v9  ;;  %v284_v23 = vsub.f32 %v1992_v53, %v283_v56 }
  0x5a   :  { %2932 = vst [vmem:[#allocation101_spill] sm:$0xff] %v2206_v43  ;;  %2933 = vst [vmem:[#allocation102_spill] sm:$0xff] %v2209_v0  ;;  %v238_v44 = vand.u32 4294901760, %v237_v58  ;;  %1663 = vmatprep.subr.bf16.mxu0 %v2139_v9  ;;  %v2223_v47 = vsub.f32 %v99_v28, %v228_v55  ;;  %v255_v49 = vand.u32 4294901760, %v254_v1  ;;  %v273_v20 = vand.u32 4294901760, %v272_v45 }
  0x5b   :  { %v296_v50 = vsub.f32 %v1994_v54, %v295_v38  ;;  %v261_v51 = vand.u32 4294901760, %v260_v63  ;;  %v313_v33 = vand.u32 4294901760, %v2007_v2  ;;  %v2230_v16 = vpack.c.bf16 %v232_v14, %v228_v55 }
  0x5c   :  { %2934 = vst [vmem:[#allocation103_spill] sm:$0xff] %v2223_v47  ;;  %239 = vmatprep.mubr.f32.mxu1 %v238_v44  ;;  %1473 = vmatpush1.bf16.msra.mxu1 %v2147_v13  ;;  %v2232_v22 = vsub.f32 %v101_v8, %v232_v14  ;;  %v279_v28 = vand.u32 4294901760, %v278_v62  ;;  %v291_v44 = vand.u32 4294901760, %v290_v36  ;;  %v1678_v1 = vpack.c.bf16 %v265_v48, %v253_v27 }
  0x5d   :  { %1665 = vmatpush1.bf16.msra.mxu0 %v2147_v13  ;;  %2935 = vst [vmem:[#allocation104_spill] sm:$0xff] %v2230_v16  ;;  %1475 = vmatprep.subr.bf16.mxu1 %v2153_v19  ;;  %v2236_v45 = vpack.c.bf16 %v271_v61, %v259_v40  ;;  %v285_v63 = vand.u32 4294901760, %v284_v23  ;;  %v297_v34 = vand.u32 4294901760, %v296_v50  ;;  %v1486_v58 = vpack.c.bf16 %v267_v46, %v255_v49 }
  0x5e   :  { %2936 = vst [vmem:[#allocation105_spill] sm:$0xff] %v2232_v22  ;;  %1667 = vmatprep.subr.bf16.mxu0 %v2153_v19  ;;  %v2937_v9 = vand.u32 4294901760, %v2206_v43  ;;  %v307_v8 = vand.u32 4294901760, %v2010_v3  ;;  %v319_v14 = vand.u32 4294901760, %v2013_v4  ;;  %v2245_v55 = vpack.c.bf16 %v273_v20, %v261_v51 }
  0x5f   :  { %v2247_v62 = vpack.c.bf16 %v289_v29, %v277_v37  ;;  %v302_v27 = vsub.f32 %v2000_v60, %v301_v52  ;;  %v314_v40 = vsub.f32 %v2007_v2, %v313_v33  ;;  %v2253_v46 = vpack.c.bf16 %v291_v44, %v279_v28  ;;  %v2997_v60 = vld [vmem:[#allocation60_spill] sm:$0xff] }
  0x60   :  { %v2241_v13 = vsub.f32 %v2206_v43, %v2937_v9  ;;  %1477 = vmatpush1.bf16.msra.mxu1 %v2161_v59  ;;  %v2255_v50 = vpack.c.bf16 %v295_v38, %v283_v56  ;;  %v325_v49 = vand.u32 4294901760, %v2015_v5  ;;  %v337_v9 = vand.u32 4294901760, %v2017_v6 }
  0x61   :  { %1669 = vmatpush1.bf16.msra.mxu0 %v2161_v59  ;;  %1479 = vmatprep.subr.bf16.mxu1 %v2171_v11  ;;  %v2261_v51 = vpack.c.bf16 %v297_v34, %v285_v63  ;;  %v2263_v29 = vpack.c.bf16 %v313_v33, %v301_v52  ;;  %v331_v20 = vand.u32 4294901760, %v2019_v7  ;;  %v343_v37 = vand.u32 4294901760, %v2022_v12 }
  0x62   :  { %1671 = vmatprep.subr.bf16.mxu0 %v2171_v11  ;;  %v308_v23 = vsub.f32 %v2010_v3, %v307_v8  ;;  %v320_v48 = vsub.f32 %v2013_v4, %v319_v14  ;;  %v349_v61 = vand.u32 4294901760, %v2028_v17  ;;  %v361_v38 = vand.u32 4294901760, %v2030_v18  ;;  %v3006_v3 = vld [vmem:[#allocation76_spill] sm:$0xff] }
  0x63   :  { %v303_v56 = vand.u32 4294901760, %v302_v27  ;;  %v315_v36 = vand.u32 4294901760, %v314_v40  ;;  %v355_v28 = vand.u32 4294901760, %v2035_v24  ;;  %v367_v44 = vand.u32 4294901760, %v2037_v25 }
  0x64   :  { %1481 = vmatpush1.bf16.msra.mxu1 %v2184_v30  ;;  %v326_v52 = vsub.f32 %v2015_v5, %v325_v49  ;;  %v338_v33 = vsub.f32 %v2017_v6, %v337_v9  ;;  %v373_v63 = vand.u32 4294901760, %v2039_v31  ;;  %v385_v34 = vand.u32 4294901760, %v2041_v32 }
  0x65   :  { %1673 = vmatpush1.bf16.msra.mxu0 %v2184_v30  ;;  %1483 = vmatprep.subr.bf16.mxu1 %v2209_v0  ;;  %v244_v27 = vand.u32 4294901760, %v2241_v13  ;;  %v2282_v40 = vpack.c.bf16 %v319_v14, %v307_v8  ;;  %v332_v11 = vsub.f32 %v2019_v7, %v331_v20  ;;  %v344_v30 = vsub.f32 %v2022_v12, %v343_v37  ;;  %v2988_v7 = vld [vmem:[#allocation45_spill] sm:$0xff]  ;;  %v2989_v12 = vld [vmem:[#allocation46_spill] sm:$0xff] }
  0x66   :  { %1675 = vmatprep.subr.bf16.mxu0 %v2209_v0  ;;  %v309_v59 = vand.u32 4294901760, %v308_v23  ;;  %v321_v19 = vand.u32 4294901760, %v320_v48  ;;  %v350_v22 = vsub.f32 %v2028_v17, %v349_v61  ;;  %v362_v47 = vsub.f32 %v2030_v18, %v361_v38  ;;  %v2938_v18 = vld [vmem:[#allocation45_spill] sm:$0xff] }
  0x67   :  { %v1494_v6 = vpack.c.bf16 %v315_v36, %v303_v56  ;;  %v2288_v5 = vpack.c.bf16 %v337_v9, %v325_v49  ;;  %v356_v4 = vsub.f32 %v2035_v24, %v355_v28  ;;  %v368_v0 = vsub.f32 %v2037_v25, %v367_v44 }
  0x68   :  { %1485 = vmatpush1.bf16.msra.mxu1 %v2230_v16  ;;  %v327_v13 = vand.u32 4294901760, %v326_v52  ;;  %v339_v8 = vand.u32 4294901760, %v338_v33  ;;  %v374_v14 = vsub.f32 %v2039_v31, %v373_v63  ;;  %v386_v23 = vsub.f32 %v2041_v32, %v385_v34 }
  0x69   :  { %1677 = vmatpush1.bf16.msra.mxu0 %v2230_v16  ;;  %1487 = vmatprep.subr.bf16.mxu1 %v1486_v58  ;;  %v333_v48 = vand.u32 4294901760, %v332_v11  ;;  %v345_v56 = vand.u32 4294901760, %v344_v30  ;;  %v379_v49 = vand.u32 4294901760, %v2045_v35  ;;  %v391_v9 = vand.u32 4294901760, %v2049_v39 }
  0x6a   :  { %1679 = vmatprep.subr.bf16.mxu0 %v1678_v1  ;;  %v1496_v36 = vpack.c.bf16 %v321_v19, %v309_v59  ;;  %v351_v25 = vand.u32 4294901760, %v350_v22  ;;  %v363_v24 = vand.u32 4294901760, %v362_v47  ;;  %v397_v17 = vand.u32 4294901760, %v2938_v18  ;;  %v2940_v1 = vld [vmem:[#allocation46_spill] sm:$0xff] }
  0x6b   :  { %245 = vmatmul.mubr.f32.vlgmr.msra.gmra.mrb[0].mxu1 %v244_v27  ;;  %v2939_v52 = vand.u32 4294901760, %v2206_v43  ;;  %v2301_v33 = vpack.c.bf16 %v343_v37, %v331_v20  ;;  %v357_v16 = vand.u32 4294901760, %v356_v4  ;;  %v369_v58 = vand.u32 4294901760, %v368_v0  ;;  %v2941_v0 = vld [vmem:[#allocation48_spill] sm:$0xff] }
  0x6c   :  { %v409_v11 = vand.u32 4294901760, %v2940_v1  ;;  %1489 = vmatpush1.bf16.msra.mxu1 %v2245_v55  ;;  %v1498_v30 = vpack.c.bf16 %v339_v8, %v327_v13  ;;  %v2306_v19 = vpack.c.bf16 %v361_v38, %v349_v61  ;;  %v375_v47 = vand.u32 4294901760, %v374_v14  ;;  %v2942_v61 = vld [vmem:[#allocation49_spill] sm:$0xff]  ;;  %636 = vmatprep.mubr.f32.mxu1 %v2167_v42  ;;  %v2943_v8 = vld [vmem:[#allocation50_spill] sm:$0xff] }
  0x6d   :  { %982 = vmatmul.mubr.f32.vlgmr.msra.gmra.mrb[0].mxu0 %v2939_v52  ;;  %v387_v59 = vand.u32 4294901760, %v386_v23  ;;  %1491 = vmatprep.subr.bf16.mxu1 %v2253_v46  ;;  %v1500_v22 = vpack.c.bf16 %v345_v56, %v333_v48  ;;  %v380_v20 = vsub.f32 %v2045_v35, %v379_v49  ;;  %v392_v4 = vsub.f32 %v2049_v39, %v391_v9  ;;  %v2946_v48 = vld [vmem:[#allocation55_spill] sm:$0xff]  ;;  %v2950_v39 = vld [vmem:[#allocation61_spill] sm:$0xff] }
  0x6e   :  { %1681 = vmatpush1.bf16.msra.mxu0 %v2236_v45  ;;  %v403_v37 = vand.u32 4294901760, %v2941_v0  ;;  %v1502_v27 = vpack.c.bf16 %v363_v24, %v351_v25  ;;  %v2313_v55 = vpack.c.bf16 %v367_v44, %v355_v28  ;;  %v398_v45 = vsub.f32 %v2938_v18, %v397_v17  ;;  %1245 = vmatprep.mubr.f32.mxu0 %v2167_v42  ;;  %v2944_v25 = vld [vmem:[#allocation52_spill] sm:$0xff]  ;;  %v2945_v44 = vld [vmem:[#allocation54_spill] sm:$0xff] }
  0x6f   :  { %1683 = vmatprep.subr.bf16.mxu0 %v2247_v62  ;;  %v415_v38 = vand.u32 4294901760, %v2942_v61  ;;  %v1504_v46 = vpack.c.bf16 %v369_v58, %v357_v16  ;;  %v2319_v62 = vpack.c.bf16 %v385_v34, %v373_v63  ;;  %v410_v13 = vsub.f32 %v2940_v1, %v409_v11  ;;  %v2949_v18 = vld [vmem:[#allocation60_spill] sm:$0xff] }
  0x70   :  { %v421_v14 = vand.u32 4294901760, %v2943_v8  ;;  %1493 = vmatpush1.bf16.msra.mxu1 %v2261_v51  ;;  %v1506_v24 = vpack.c.bf16 %v387_v59, %v375_v47  ;;  %v433_v28 = vand.u32 4294901760, %v2944_v25  ;;  %v427_v23 = vand.u32 4294901760, %v2945_v44  ;;  %v2948_v59 = vld [vmem:[#allocation58_spill] sm:$0xff] }
  0x71   :  { %v439_v56 = vand.u32 4294901760, %v2946_v48  ;;  %1495 = vmatprep.subr.bf16.mxu1 %v1494_v6  ;;  %v381_v16 = vand.u32 4294901760, %v380_v20  ;;  %v393_v63 = vand.u32 4294901760, %v392_v4  ;;  %v2329_v34 = vpack.c.bf16 %v391_v9, %v379_v49 }
  0x72   :  { %1685 = vmatpush1.bf16.msra.mxu0 %v2255_v50  ;;  %v404_v52 = vsub.f32 %v2941_v0, %v403_v37  ;;  %v399_v58 = vand.u32 4294901760, %v398_v45  ;;  %v416_v51 = vsub.f32 %v2942_v61, %v415_v38  ;;  %v2947_v50 = vld [vmem:[#allocation57_spill] sm:$0xff]  ;;  %v457_v43 = vand.u32 4294901760, %v2948_v59  ;;  %v2952_v61 = vld [vmem:[#allocation64_spill] sm:$0xff] }
  0x73   :  { %1687 = vmatprep.subr.bf16.mxu0 %v2263_v29  ;;  %v445_v47 = vand.u32 4294901760, %v2947_v50  ;;  %v411_v42 = vand.u32 4294901760, %v410_v13  ;;  %v422_v1 = vsub.f32 %v2943_v8, %v421_v14  ;;  %v451_v6 = vand.u32 4294901760, %v2949_v18  ;;  %v2951_v13 = vld [vmem:[#allocation63_spill] sm:$0xff] }
  0x74   :  { %v463_v29 = vand.u32 4294901760, %v2950_v39  ;;  %1497 = vmatpush1.bf16.msra.mxu1 %v1496_v36  ;;  %v434_v49 = vsub.f32 %v2944_v25, %v433_v28  ;;  %v428_v9 = vsub.f32 %v2945_v44, %v427_v23  ;;  %v440_v20 = vsub.f32 %v2946_v48, %v439_v56 }
  0x75   :  { %1499 = vmatprep.subr.bf16.mxu1 %v1498_v30  ;;  %v1702_v4 = vpack.c.bf16 %v409_v11, %v397_v17  ;;  %v2343_v45 = vpack.c.bf16 %v415_v38, %v403_v37  ;;  %v469_v8 = vand.u32 4294901760, %v2951_v13  ;;  %v481_v0 = vand.u32 4294901760, %v2952_v61 }
  0x76   :  { %1689 = vmatpush1.bf16.msra.mxu0 %v2282_v40  ;;  %v405_v35 = vand.u32 4294901760, %v404_v52  ;;  %v417_v36 = vand.u32 4294901760, %v416_v51  ;;  %v446_v40 = vsub.f32 %v2947_v50, %v445_v47  ;;  %v458_v25 = vsub.f32 %v2948_v59, %v457_v43  ;;  %v3005_v50 = vld [vmem:[#allocation75_spill] sm:$0xff] }
  0x77   :  { %1691 = vmatprep.subr.bf16.mxu0 %v2288_v5  ;;  %v1508_v32 = vpack.c.bf16 %v393_v63, %v381_v16  ;;  %v1510_v44 = vpack.c.bf16 %v411_v42, %v399_v58  ;;  %v452_v48 = vsub.f32 %v2949_v18, %v451_v6  ;;  %v464_v30 = vsub.f32 %v2950_v39, %v463_v29  ;;  %v2953_v16 = vld [vmem:[#allocation66_spill] sm:$0xff]  ;;  %v2954_v63 = vld [vmem:[#allocation67_spill] sm:$0xff] }
  0x78   :  { %1501 = vmatpush1.bf16.msra.mxu1 %v1500_v22  ;;  %v423_v5 = vand.u32 4294901760, %v422_v1  ;;  %v435_v17 = vand.u32 4294901760, %v434_v49  ;;  %v429_v11 = vand.u32 4294901760, %v428_v9  ;;  %v441_v37 = vand.u32 4294901760, %v440_v20  ;;  %v2955_v20 = vld [vmem:[#allocation69_spill] sm:$0xff] }
  0x79   :  { %1503 = vmatprep.subr.bf16.mxu1 %v1502_v27  ;;  %v470_v38 = vsub.f32 %v2951_v13, %v469_v8  ;;  %v482_v52 = vsub.f32 %v2952_v61, %v481_v0  ;;  %v475_v42 = vand.u32 4294901760, %v2953_v16  ;;  %v487_v58 = vand.u32 4294901760, %v2954_v63  ;;  %v2956_v13 = vld [vmem:[#allocation70_spill] sm:$0xff] }
  0x7a   :  { %1693 = vmatpush1.bf16.msra.mxu0 %v2301_v33  ;;  %v1512_v51 = vpack.c.bf16 %v417_v36, %v405_v35  ;;  %v1706_v39 = vpack.c.bf16 %v433_v28, %v421_v14  ;;  %v447_v22 = vand.u32 4294901760, %v446_v40  ;;  %v459_v18 = vand.u32 4294901760, %v458_v25 }
  0x7b   :  { %1695 = vmatprep.subr.bf16.mxu0 %v2306_v19  ;;  %v2357_v33 = vpack.c.bf16 %v439_v56, %v427_v23  ;;  %v2359_v1 = vpack.c.bf16 %v457_v43, %v445_v47  ;;  %v453_v49 = vand.u32 4294901760, %v452_v48  ;;  %v465_v27 = vand.u32 4294901760, %v464_v30  ;;  %v2960_v30 = vld [vmem:[#allocation79_spill] sm:$0xff] }
  0x7c   :  { %1505 = vmatpush1.bf16.msra.mxu1 %v1504_v46  ;;  %v1514_v19 = vpack.c.bf16 %v435_v17, %v423_v5  ;;  %v1516_v9 = vpack.c.bf16 %v441_v37, %v429_v11  ;;  %v493_v61 = vand.u32 4294901760, %v2955_v20  ;;  %v505_v59 = vand.u32 4294901760, %v2956_v13 }
  0x7d   :  { %1507 = vmatprep.subr.bf16.mxu1 %v1506_v24  ;;  %v471_v35 = vand.u32 4294901760, %v470_v38  ;;  %v483_v14 = vand.u32 4294901760, %v482_v52  ;;  %v476_v25 = vsub.f32 %v2953_v16, %v475_v42  ;;  %v488_v43 = vsub.f32 %v2954_v63, %v487_v58  ;;  %v2957_v24 = vld [vmem:[#allocation75_spill] sm:$0xff]  ;;  %v3010_v16 = vld [vmem:[#allocation84_spill] sm:$0xff] }
  0x7e   :  { %1697 = vmatpush1.bf16.msra.mxu0 %v2313_v55  ;;  %v1518_v28 = vpack.c.bf16 %v459_v18, %v447_v22  ;;  %v2367_v23 = vpack.c.bf16 %v463_v29, %v451_v6  ;;  %v499_v55 = vand.u32 4294901760, %v2121_v21  ;;  %v511_v46 = vand.u32 4294901760, %v2123_v41  ;;  %v2959_v6 = vld [vmem:[#allocation78_spill] sm:$0xff] }
  0x7f   :  { %1699 = vmatprep.subr.bf16.mxu0 %v2319_v62  ;;  %v2371_v48 = vpack.c.bf16 %v465_v27, %v453_v49  ;;  %v2373_v56 = vpack.c.bf16 %v481_v0, %v469_v8  ;;  %v517_v47 = vand.u32 4294901760, %v2957_v24  ;;  %v2958_v62 = vld [vmem:[#allocation76_spill] sm:$0xff]  ;;  %v494_v40 = vsub.f32 %v2955_v20, %v493_v61 }
  0x80   :  { %v529_v36 = vand.u32 4294901760, %v2958_v62  ;;  %1509 = vmatpush1.bf16.msra.mxu1 %v1508_v32  ;;  %v506_v18 = vsub.f32 %v2956_v13, %v505_v59  ;;  %v523_v29 = vand.u32 4294901760, %v2959_v6  ;;  %v535_v5 = vand.u32 4294901760, %v2960_v30 }
  0x81   :  { %1511 = vmatprep.subr.bf16.mxu1 %v1510_v44  ;;  %v1522_v17 = vpack.c.bf16 %v483_v14, %v471_v35  ;;  %v477_v0 = vand.u32 4294901760, %v476_v25  ;;  %v489_v8 = vand.u32 4294901760, %v488_v43  ;;  %v2382_v11 = vpack.c.bf16 %v487_v58, %v475_v42  ;;  %v2962_v43 = vld [vmem:[#allocation86_spill] sm:$0xff] }
  0x82   :  { %1701 = vmatpush1.bf16.msra.mxu0 %v2329_v34  ;;  %v500_v37 = vsub.f32 %v2121_v21, %v499_v55  ;;  %v512_v32 = vsub.f32 %v2123_v41, %v511_v46  ;;  %v2961_v34 = vld [vmem:[#allocation81_spill] sm:$0xff]  ;;  %v553_v52 = vand.u32 4294901760, %v2145_v57  ;;  %v518_v22 = vsub.f32 %v2957_v24, %v517_v47 }
  0x83   :  { %1703 = vmatprep.subr.bf16.mxu0 %v1702_v4  ;;  %v541_v38 = vand.u32 4294901760, %v2961_v34  ;;  %v530_v49 = vsub.f32 %v2958_v62, %v529_v36  ;;  %v547_v44 = vand.u32 4294901760, %v2149_v10  ;;  %v559_v4 = vand.u32 4294901760, %v2151_v15  ;;  %v2963_v62 = vld [vmem:[#allocation87_spill] sm:$0xff] }
  0x84   :  { %1513 = vmatpush1.bf16.msra.mxu1 %v1512_v51  ;;  %v495_v42 = vand.u32 4294901760, %v494_v40  ;;  %v507_v58 = vand.u32 4294901760, %v506_v18  ;;  %v524_v27 = vsub.f32 %v2959_v6, %v523_v29  ;;  %v536_v35 = vsub.f32 %v2960_v30, %v535_v5 }
  0x85   :  { %1515 = vmatprep.subr.bf16.mxu1 %v1514_v19  ;;  %v1524_v14 = vpack.c.bf16 %v489_v8, %v477_v0  ;;  %v1718_v25 = vpack.c.bf16 %v505_v59, %v493_v61  ;;  %v565_v24 = vand.u32 4294901760, %v2962_v43  ;;  %v577_v41 = vand.u32 4294901760, %v2963_v62 }
  0x86   :  { %1705 = vmatpush1.bf16.msra.mxu0 %v2343_v45  ;;  %v501_v21 = vand.u32 4294901760, %v500_v37  ;;  %v513_v13 = vand.u32 4294901760, %v512_v32  ;;  %v542_v51 = vsub.f32 %v2961_v34, %v541_v38  ;;  %v554_v45 = vsub.f32 %v2145_v57, %v553_v52  ;;  %v2964_v32 = vld [vmem:[#allocation89_spill] sm:$0xff] }
  0x87   :  { %1707 = vmatprep.subr.bf16.mxu0 %v1706_v39  ;;  %v519_v40 = vand.u32 4294901760, %v518_v22  ;;  %v531_v18 = vand.u32 4294901760, %v530_v49  ;;  %v548_v6 = vsub.f32 %v2149_v10, %v547_v44  ;;  %v560_v30 = vsub.f32 %v2151_v15, %v559_v4  ;;  %v2965_v10 = vld [vmem:[#allocation90_spill] sm:$0xff] }
  0x88   :  { %1517 = vmatpush1.bf16.msra.mxu1 %v1516_v9  ;;  %v1526_v39 = vpack.c.bf16 %v507_v58, %v495_v42  ;;  %v1720_v61 = vpack.c.bf16 %v511_v46, %v499_v55  ;;  %v525_v59 = vand.u32 4294901760, %v524_v27  ;;  %v537_v19 = vand.u32 4294901760, %v536_v35 }
  0x89   :  { %1519 = vmatprep.subr.bf16.mxu1 %v1518_v28  ;;  %v1722_v0 = vpack.c.bf16 %v529_v36, %v517_v47  ;;  %v566_v8 = vsub.f32 %v2962_v43, %v565_v24  ;;  %v578_v37 = vsub.f32 %v2963_v62, %v577_v41  ;;  %v2830_v22 = vand.u32 4294901760, %v2964_v32  ;;  %v2966_v36 = vld [vmem:[#allocation93_spill] sm:$0xff] }
  0x8a   :  { %1709 = vmatpush1.bf16.msra.mxu0 %v2357_v33  ;;  %v2406_v49 = vpack.c.bf16 %v535_v5, %v523_v29  ;;  %v543_v15 = vand.u32 4294901760, %v542_v51  ;;  %v555_v9 = vand.u32 4294901760, %v554_v45  ;;  %v2828_v33 = vand.u32 4294901760, %v2965_v10  ;;  %v2971_v51 = vld [vmem:[#allocation18_spill] sm:$0xff]  ;;  %v2972_v45 = vld [vmem:[#allocation19_spill] sm:$0xff] }
  0x8b   :  { %1711 = vmatprep.subr.bf16.mxu0 %v2359_v1  ;;  %v1528_v42 = vpack.c.bf16 %v513_v13, %v501_v21  ;;  %v1530_v55 = vpack.c.bf16 %v531_v18, %v519_v40  ;;  %v549_v46 = vand.u32 4294901760, %v548_v6  ;;  %v561_v58 = vand.u32 4294901760, %v560_v30  ;;  %v2967_v13 = vld [vmem:[#allocation94_spill] sm:$0xff]  ;;  %v2984_v40 = vld [vmem:[#allocation103_spill] sm:$0xff] }
  0x8c   :  { %1521 = vmatpush1.bf16.msra.mxu1 %v2371_v48  ;;  %v1532_v1 = vpack.c.bf16 %v537_v19, %v525_v59  ;;  %v1726_v28 = vpack.c.bf16 %v553_v52, %v541_v38  ;;  %v2411_v47 = vpack.c.bf16 %v559_v4, %v547_v44  ;;  %v2827_v27 = vand.u32 4294901760, %v2966_v36  ;;  %v2968_v38 = vld [vmem:[#allocation98_spill] sm:$0xff]  ;;  %v2970_v4 = vld [vmem:[#allocation100_spill] sm:$0xff]  ;;  %v2976_v19 = vld [vmem:[#allocation23_spill] sm:$0xff] }
  0x8d   :  { %1523 = vmatprep.subr.bf16.mxu1 %v1522_v17  ;;  %v567_v29 = vand.u32 4294901760, %v566_v8  ;;  %v579_v5 = vand.u32 4294901760, %v578_v37  ;;  %v2418_v21 = vsub.f32 %v2964_v32, %v2830_v22  ;;  %v2826_v48 = vand.u32 4294901760, %v2967_v13  ;;  %v2975_v59 = vld [vmem:[#allocation22_spill] sm:$0xff]  ;;  %v3004_v8 = vld [vmem:[#allocation73_spill] sm:$0xff] }
  0x8e   :  { %1713 = vmatpush1.bf16.msra.mxu0 %v2367_v23  ;;  %v1534_v6 = vpack.c.bf16 %v555_v9, %v543_v15  ;;  %v2421_v23 = vpack.c.bf16 %v577_v41, %v565_v24  ;;  %v584_v30 = vsub.f32 %v2965_v10, %v2828_v33  ;;  %v2824_v17 = vand.u32 4294901760, %v2968_v38  ;;  %v2973_v41 = vld [vmem:[#allocation20_spill] sm:$0xff]  ;;  %v2974_v24 = vld [vmem:[#allocation21_spill] sm:$0xff] }
  0x8f   :  { %1715 = vmatprep.subr.bf16.mxu0 %v2373_v56  ;;  %v2427_v52 = vpack.c.bf16 %v561_v58, %v549_v46  ;;  %v2969_v56 = vld [vmem:[#allocation99_spill] sm:$0xff]  ;;  %v2829_v35 = vand.u32 4294901760, %v2970_v4  ;;  %v2437_v15 = vsub.f32 %v2966_v36, %v2827_v27  ;;  %v1538_v37 = vpack.c.bf16 %v579_v5, %v567_v29  ;;  %v3003_v33 = vld [vmem:[#allocation72_spill] sm:$0xff] }
  0x90   :  { %v2825_v44 = vand.u32 4294901760, %v2969_v56  ;;  %1525 = vmatpush1.bf16.msra.mxu1 %v1524_v14  ;;  %v573_v9 = vand.u32 4294901760, %v2418_v21  ;;  %v2833_v14 = vand.u32 4294901760, %v2219_v26  ;;  %v585_v46 = vand.u32 4294901760, %v584_v30  ;;  %v2987_v30 = vld [vmem:[#allocation43_spill] sm:$0xff] }
  0x91   :  { %1527 = vmatprep.subr.bf16.mxu1 %v1526_v39  ;;  %v596_v58 = vsub.f32 %v2968_v38, %v2824_v17  ;;  %v2461_v29 = vsub.f32 %v2970_v4, %v2829_v35  ;;  %v591_v18 = vand.u32 4294901760, %v2437_v15  ;;  %v2990_v17 = vld [vmem:[#allocation48_spill] sm:$0xff]  ;;  %v2998_v15 = vld [vmem:[#allocation61_spill] sm:$0xff] }
  0x92   :  { %1717 = vmatpush1.bf16.msra.mxu0 %v2382_v11  ;;  %v602_v11 = vsub.f32 %v2967_v13, %v2826_v48  ;;  %v608_v39 = vsub.f32 %v2969_v56, %v2825_v44  ;;  %v626_v21 = vsub.f32 %v2219_v26, %v2833_v14  ;;  %v2991_v44 = vld [vmem:[#allocation49_spill] sm:$0xff]  ;;  %v3011_v48 = vand.u32 4294901760, %v2964_v32 }
  0x93   :  { %1719 = vmatprep.subr.bf16.mxu0 %v1718_v25  ;;  %v3001_v35 = vld [vmem:[#allocation105_spill] sm:$0xff]  ;;  %v3008_v25 = vld [vmem:[#allocation79_spill] sm:$0xff]  ;;  %v615_v14 = vand.u32 4294901760, %v2461_v29 }
  0x94   :  { %1529 = vmatpush1.bf16.msra.mxu1 %v1528_v42  ;;  %v619_v42 = vand.u32 4294901760, %v2984_v40  ;;  %v631_v27 = vand.u32 4294901760, %v3001_v35  ;;  %v603_v22 = vand.u32 4294901760, %v602_v11  ;;  %v1540_v11 = vpack.c.bf16 %v585_v46, %v573_v9 }
  0x95   :  { %1531 = vmatprep.subr.bf16.mxu1 %v1530_v55  ;;  %v3002_v55 = vld [vmem:[#allocation70_spill] sm:$0xff]  ;;  %v609_v5 = vand.u32 4294901760, %v608_v39  ;;  %v3013_v46 = vand.u32 4294901760, %v2966_v36  ;;  %v3016_v39 = vand.u32 4294901760, %v2969_v56 }
  0x96   :  { %1721 = vmatpush1.bf16.msra.mxu0 %v1720_v61  ;;  %v3007_v61 = vld [vmem:[#allocation78_spill] sm:$0xff]  ;;  %v632_v9 = vsub.f32 %v3001_v35, %v631_v27 }
  0x97   :  { %1723 = vmatprep.subr.bf16.mxu0 %v1722_v0  ;;  %v2993_v0 = vld [vmem:[#allocation52_spill] sm:$0xff] }
  0x98   :  { %1533 = vmatpush1.bf16.msra.mxu1 %v1532_v1  ;;  %v3009_v1 = vld [vmem:[#allocation83_spill] sm:$0xff]  ;;  %v633_v35 = vand.u32 4294901760, %v632_v9  ;;  %v3036_v9 = vld [vmem:[#allocation16_spill] sm:$0xff] }
  0x99   :  { %1535 = vmatprep.subr.bf16.mxu1 %v1534_v6  ;;  %v597_v6 = vand.u32 4294901760, %v596_v58  ;;  %v3015_v58 = vand.u32 4294901760, %v2968_v38 }
  0x9a   :  { %1725 = vmatpush1.bf16.msra.mxu0 %v2406_v49  ;;  %v3012_v49 = vand.u32 4294901760, %v2965_v10 }
  0x9b   :  { %1727 = vmatprep.subr.bf16.mxu0 %v1726_v28  ;;  %v620_v28 = vsub.f32 %v2984_v40, %v619_v42  ;;  %v1736_v40 = vpack.c.bf16 %v3016_v39, %v3015_v58  ;;  %v3045_v39 = vld [vmem:[#allocation35_spill] sm:$0xff] }
  0x9c   :  { %v1732_v31 = vpack.c.bf16 %v3012_v49, %v3011_v48  ;;  %1537 = vmatpush1.bf16.msra.mxu1 %v2427_v52  ;;  %v1542_v48 = vpack.c.bf16 %v603_v22, %v591_v18  ;;  %v3014_v49 = vand.u32 4294901760, %v2967_v13  ;;  %v627_v52 = vand.u32 4294901760, %v626_v21  ;;  %v3020_v21 = vld [vmem:[#allocation11_spill] sm:$0xff] }
  0x9d   :  { %1539 = vmatprep.subr.bf16.mxu1 %v1538_v37  ;;  %v621_v37 = vand.u32 4294901760, %v620_v28  ;;  %v3018_v18 = vand.u32 4294901760, %v2219_v26  ;;  %v3032_v28 = vld [vmem:[#allocation15_spill] sm:$0xff] }
  0x9e   :  { %1729 = vmatpush1.bf16.msra.mxu0 %v2411_v47  ;;  %v1734_v63 = vpack.c.bf16 %v3014_v49, %v3013_v46  ;;  %v1544_v47 = vpack.c.bf16 %v609_v5, %v597_v6  ;;  %v1546_v22 = vpack.c.bf16 %v627_v52, %v615_v14  ;;  %v3019_v5 = vpack.c.bf16 %v2972_v45, %v2971_v51  ;;  %v3026_v51 = vld [vmem:[#allocation95_spill] sm:$0xff]  ;;  %v3029_v6 = vld [vmem:[#allocation14_spill] sm:$0xff]  ;;  %v3038_v49 = vld [vmem:[#allocation29_spill] sm:$0xff] }
  0x9f   :  { %1731 = vmatprep.subr.bf16.mxu0 %v2421_v23  ;;  %v3017_v23 = vand.u32 4294901760, %v2970_v4  ;;  %v1548_v29 = vpack.c.bf16 %v633_v35, %v621_v37  ;;  %v3022_v14 = vpack.c.bf16 %v2974_v24, %v2973_v41  ;;  %v3023_v35 = vld [vmem:[#allocation12_spill] sm:$0xff]  ;;  %v3027_v45 = vld [vmem:[#allocation91_spill] sm:$0xff]  ;;  %v3030_v41 = vld [vmem:[#allocation25_spill] sm:$0xff] }
  0xa0   :  { %1541 = vmatpush1.bf16.msra.mxu1 %v1540_v11  ;;  %v3031_v24 = vpack.c.bf16 %v2007_v2, %v3030_v41  ;;  %v3044_v2 = vld [vmem:[#allocation24_spill] sm:$0xff]  ;;  %v3046_v37 = vld [vmem:[#allocation34_spill] sm:$0xff]  ;;  %v3063_v41 = vld [vmem:[#allocation47_spill] sm:$0xff] }
  0xa1   :  { %1543 = vmatprep.subr.bf16.mxu1 %v1542_v48  ;;  %v1738_v46 = vpack.c.bf16 %v3018_v18, %v3017_v23  ;;  %v3037_v48 = vld [vmem:[#allocation30_spill] sm:$0xff] }
  0xa2   :  { %1733 = vmatpush1.bf16.msra.mxu0 %v1732_v31  ;;  %v1740_v31 = vpack.c.bf16 %v631_v27, %v619_v42  ;;  %v3024_v27 = vpack.c.bf16 %v2976_v19, %v2975_v59  ;;  %v3028_v42 = vpack.c.bf16 %v1994_v54, %v1992_v53  ;;  %v3033_v59 = vld [vmem:[#allocation28_spill] sm:$0xff]  ;;  %v3034_v19 = vld [vmem:[#allocation27_spill] sm:$0xff]  ;;  %v3039_v52 = vpack.c.bf16 %v3037_v48, %v3038_v49  ;;  %v3040_v53 = vld [vmem:[#allocation17_spill] sm:$0xff] }
  0xa3   :  { %1735 = vmatprep.subr.bf16.mxu0 %v1734_v63  ;;  %v3021_v63 = vld [vmem:[#allocation96_spill] sm:$0xff]  ;;  %v3035_v11 = vpack.c.bf16 %v3033_v59, %v3034_v19  ;;  %v3048_v23 = vld [vmem:[#allocation26_spill] sm:$0xff]  ;;  %v3067_v59 = vld [vmem:[#allocation55_spill] sm:$0xff] }
  0xa4   :  { %1545 = vmatpush1.bf16.msra.mxu1 %v1544_v47  ;;  %v3041_v54 = vld [vmem:[#allocation32_spill] sm:$0xff]  ;;  %v3042_v47 = vld [vmem:[#allocation31_spill] sm:$0xff]  ;;  %v3049_v18 = vld [vmem:[#allocation38_spill] sm:$0xff] }
  0xa5   :  { %1547 = vmatprep.subr.bf16.mxu1 %v1546_v22  ;;  %v3043_v58 = vpack.c.bf16 %v3041_v54, %v3042_v47  ;;  %v3047_v22 = vpack.c.bf16 %v3045_v39, %v3046_v37  ;;  %v3068_v19 = vld [vmem:[#allocation54_spill] sm:$0xff]  ;;  %v3077_v49 = vld [vmem:[#allocation64_spill] sm:$0xff]  ;;  %v3081_v47 = vld [vmem:[#allocation67_spill] sm:$0xff]  ;;  %v3085_v37 = vpack.c.bf16 %v3002_v55, %v2955_v20  ;;  %v3093_v55 = vpack.c.bf16 %v2145_v57, %v2961_v34 }
  0xa6   :  { %1737 = vmatpush1.bf16.msra.mxu0 %v1736_v40  ;;  %v3025_v40 = vld [vmem:[#allocation13_spill] sm:$0xff]  ;;  %v3080_v54 = vld [vmem:[#allocation62_spill] sm:$0xff]  ;;  %v3100_v57 = vld [vmem:[#allocation88_spill] sm:$0xff]  ;;  %v3101_v34 = vpack.c.bf16 %v2967_v13, %v2966_v36 }
  0xa7   :  { %1739 = vmatprep.subr.bf16.mxu0 %v1738_v46  ;;  %v3050_v46 = vld [vmem:[#allocation37_spill] sm:$0xff]  ;;  %v3110_v36 = vld [vmem:[#allocation104_spill] sm:$0xff] }
  0xa8   :  { %1549 = vmatpush1.bf16.msra.mxu1 %v1548_v29  ;;  %v3051_v29 = vpack.c.bf16 %v3049_v18, %v3050_v46  ;;  %v3084_v39 = vld [vmem:[#allocation65_spill] sm:$0xff]  ;;  %v3090_v18 = vld [vmem:[#allocation74_spill] sm:$0xff]  ;;  %v3091_v46 = vpack.c.bf16 %v3008_v25, %v3007_v61  ;;  %v3099_v61 = vpack.c.bf16 %v2965_v10, %v2964_v32 }
  0xa9   :  { %1551 = vmatprep.subr.bf16.mxu1 %v3019_v5  ;;  %v3053_v5 = vld [vmem:[#allocation40_spill] sm:$0xff]  ;;  %v3092_v20 = vld [vmem:[#allocation77_spill] sm:$0xff]  ;;  %v3106_v10 = vld [vmem:[#allocation102_spill] sm:$0xff] }
  0xaa   :  { %1741 = vmatpush1.bf16.msra.mxu0 %v1740_v31  ;;  %v3052_v31 = vld [vmem:[#allocation33_spill] sm:$0xff] }
  0xab   :  { %1743 = vmatprep.subr.bf16.mxu0 %v3020_v21  ;;  %638 = vmatmul.mubr.f32.vlgmr.msra.gmra.mrb[0].mxu1 %v3021_v63  ;;  %v3054_v21 = vld [vmem:[#allocation39_spill] sm:$0xff]  ;;  %v3098_v25 = vld [vmem:[#allocation85_spill] sm:$0xff] }
  0xac   :  { %1553 = vmatpush1.bf16.msra.mxu1 %v3022_v14  ;;  %838 = vmatprep.mubr.f32.mxu1 %v3026_v51  ;;  %v3055_v14 = vpack.c.bf16 %v3053_v5, %v3054_v21  ;;  %v3059_v51 = vld [vmem:[#allocation41_spill] sm:$0xff] }
  0xad   :  { %1247 = vmatmul.mubr.f32.vlgmr.msra.gmra.mrb[0].mxu0 %v3021_v63  ;;  %1555 = vmatprep.subr.bf16.mxu1 %v3024_v27  ;;  %v3057_v27 = vld [vmem:[#allocation42_spill] sm:$0xff]  ;;  %v3107_v32 = vld [vmem:[#allocation105_spill] sm:$0xff] }
  0xae   :  { %1745 = vmatpush1.bf16.msra.mxu0 %v3023_v35  ;;  %1382 = vmatprep.mubr.f32.mxu0 %v3027_v45  ;;  %v3056_v35 = vld [vmem:[#allocation36_spill] sm:$0xff]  ;;  %v3060_v45 = vpack.c.bf16 %v2989_v12, %v2988_v7  ;;  %v3070_v7 = vld [vmem:[#allocation53_spill] sm:$0xff]  ;;  %v3071_v12 = vld [vmem:[#allocation58_spill] sm:$0xff] }
  0xaf   :  { %1747 = vmatprep.subr.bf16.mxu0 %v3025_v40  ;;  %v3058_v40 = vpack.c.bf16 %v2987_v30, %v3057_v27  ;;  %v3066_v30 = vld [vmem:[#allocation51_spill] sm:$0xff]  ;;  %v3111_v13 = vld [vmem:[#allocation101_spill] sm:$0xff] }
  0xb0   :  { %1557 = vmatpush1.bf16.msra.mxu1 %v3028_v42  ;;  %v3061_v42 = vld [vmem:[#allocation44_spill] sm:$0xff] }
  0xb1   :  { %1559 = vmatprep.subr.bf16.mxu1 %v3031_v24  ;;  %v3064_v24 = vld [vmem:[#allocation50_spill] sm:$0xff] }
  0xb2   :  { %1749 = vmatpush1.bf16.msra.mxu0 %v3029_v6  ;;  %v3062_v6 = vpack.c.bf16 %v2991_v44, %v2990_v17  ;;  %v3074_v17 = vld [vmem:[#allocation56_spill] sm:$0xff]  ;;  %v3075_v44 = vpack.c.bf16 %v2998_v15, %v2997_v60  ;;  %v3087_v15 = vpack.c.bf16 %v3004_v8, %v3003_v33  ;;  %v3095_v8 = vpack.c.bf16 %v3010_v16, %v3009_v1 }
  0xb3   :  { %1751 = vmatprep.subr.bf16.mxu0 %v3032_v28  ;;  %v3065_v28 = vpack.c.bf16 %v2993_v0, %v3064_v24  ;;  %v3076_v0 = vld [vmem:[#allocation59_spill] sm:$0xff]  ;;  %v3086_v60 = vld [vmem:[#allocation68_spill] sm:$0xff]  ;;  %v3103_v1 = vpack.c.bf16 %v2969_v56, %v2968_v38 }
  0xb4   :  { %1561 = vmatpush1.bf16.msra.mxu1 %v3035_v11  ;;  %v3069_v11 = vpack.c.bf16 %v3067_v59, %v3068_v19  ;;  %v3094_v33 = vld [vmem:[#allocation80_spill] sm:$0xff] }
  0xb5   :  { %1563 = vmatprep.subr.bf16.mxu1 %v3039_v52  ;;  %v3078_v52 = vld [vmem:[#allocation63_spill] sm:$0xff]  ;;  %v3102_v16 = vld [vmem:[#allocation92_spill] sm:$0xff] }
  0xb6   :  { %1753 = vmatpush1.bf16.msra.mxu0 %v3036_v9  ;;  %v3072_v9 = vld [vmem:[#allocation57_spill] sm:$0xff] }
  0xb7   :  { %1755 = vmatprep.subr.bf16.mxu0 %v3040_v53  ;;  %v3073_v48 = vpack.c.bf16 %v3071_v12, %v3072_v9  ;;  %v3079_v53 = vpack.c.bf16 %v3077_v49, %v3078_v52 }
  0xb8   :  { %1565 = vmatpush1.bf16.msra.mxu1 %v3043_v58  ;;  %v3082_v58 = vld [vmem:[#allocation66_spill] sm:$0xff] }
  0xb9   :  { %1567 = vmatprep.subr.bf16.mxu1 %v3047_v22  ;;  %v3088_v22 = vld [vmem:[#allocation71_spill] sm:$0xff] }
  0xba   :  { %1757 = vmatpush1.bf16.msra.mxu0 %v3044_v2  ;;  %v3083_v2 = vpack.c.bf16 %v3081_v47, %v3082_v58 }
  0xbb   :  { %1759 = vmatprep.subr.bf16.mxu0 %v3048_v23  ;;  %v3089_v23 = vpack.c.bf16 %v3006_v3, %v3005_v50  ;;  %v3096_v3 = vld [vmem:[#allocation82_spill] sm:$0xff]  ;;  %v3097_v50 = vpack.c.bf16 %v2963_v62, %v2962_v43  ;;  %v3104_v62 = vld [vmem:[#allocation97_spill] sm:$0xff]  ;;  %v3105_v43 = vpack.c.bf16 %v2219_v26, %v2970_v4 }
  0xbc   :  { %1569 = vmatpush1.bf16.msra.mxu1 %v3051_v29  ;;  %v3108_v29 = vld [vmem:[#allocation103_spill] sm:$0xff] }
  0xbd   :  { %1571 = vmatprep.subr.bf16.mxu1 %v3055_v14 }
  0xbe   :  { %1761 = vmatpush1.bf16.msra.mxu0 %v3052_v31  ;;  %v3109_v31 = vpack.c.bf16 %v3107_v32, %v3108_v29 }
  0xbf   :  { %1763 = vmatprep.subr.bf16.mxu0 %v3056_v35 }
  0xc0   :  { %1573 = vmatpush1.bf16.msra.mxu1 %v3058_v40 }
  0xc1   :  { %1575 = vmatprep.subr.bf16.mxu1 %v3060_v45 }
  0xc2   :  { %1765 = vmatpush1.bf16.msra.mxu0 %v3059_v51 }
  0xc3   :  { %1767 = vmatprep.subr.bf16.mxu0 %v3061_v42 }
  0xc4   :  { %1577 = vmatpush1.bf16.msra.mxu1 %v3062_v6 }
  0xc5   :  { %1579 = vmatprep.subr.bf16.mxu1 %v3065_v28 }
  0xc6   :  { %1769 = vmatpush1.bf16.msra.mxu0 %v3063_v41 }
  0xc7   :  { %1771 = vmatprep.subr.bf16.mxu0 %v3066_v30 }
  0xc8   :  { %1581 = vmatpush1.bf16.msra.mxu1 %v3069_v11 }
  0xc9   :  { %1583 = vmatprep.subr.bf16.mxu1 %v3073_v48 }
  0xca   :  { %1773 = vmatpush1.bf16.msra.mxu0 %v3070_v7 }
  0xcb   :  { %1775 = vmatprep.subr.bf16.mxu0 %v3074_v17 }
  0xcc   :  { %1585 = vmatpush1.bf16.msra.mxu1 %v3075_v44 }
  0xcd   :  { %1587 = vmatprep.subr.bf16.mxu1 %v3079_v53 }
  0xce   :  { %1777 = vmatpush1.bf16.msra.mxu0 %v3076_v0 }
  0xcf   :  { %1779 = vmatprep.subr.bf16.mxu0 %v3080_v54 }
  0xd0   :  { %1589 = vmatpush1.bf16.msra.mxu1 %v3083_v2 }
  0xd1   :  { %1591 = vmatprep.subr.bf16.mxu1 %v3085_v37 }
  0xd2   :  { %1781 = vmatpush1.bf16.msra.mxu0 %v3084_v39 }
  0xd3   :  { %1783 = vmatprep.subr.bf16.mxu0 %v3086_v60 }
  0xd4   :  { %1593 = vmatpush1.bf16.msra.mxu1 %v3087_v15 }
  0xd5   :  { %1595 = vmatprep.subr.bf16.mxu1 %v3089_v23 }
  0xd6   :  { %1785 = vmatpush1.bf16.msra.mxu0 %v3088_v22 }
  0xd7   :  { %1787 = vmatprep.subr.bf16.mxu0 %v3090_v18 }
  0xd8   :  { %1597 = vmatpush1.bf16.msra.mxu1 %v3091_v46 }
  0xd9   :  { %1599 = vmatprep.subr.bf16.mxu1 %v3093_v55 }
  0xda   :  { %1789 = vmatpush1.bf16.msra.mxu0 %v3092_v20 }
  0xdb   :  { %1791 = vmatprep.subr.bf16.mxu0 %v3094_v33 }
  0xdc   :  { %1601 = vmatpush1.bf16.msra.mxu1 %v3095_v8 }
  0xdd   :  { %1603 = vmatprep.subr.bf16.mxu1 %v3097_v50 }
  0xde   :  { %1793 = vmatpush1.bf16.msra.mxu0 %v3096_v3 }
  0xdf   :  { %1795 = vmatprep.subr.bf16.mxu0 %v3098_v25 }
  0xe0   :  { %1605 = vmatpush1.bf16.msra.mxu1 %v3099_v61 }
  0xe1   :  { %1607 = vmatprep.subr.bf16.mxu1 %v3101_v34 }
  0xe2   :  { %1797 = vmatpush1.bf16.msra.mxu0 %v3100_v57 }
  0xe3   :  { %1799 = vmatprep.subr.bf16.mxu0 %v3102_v16 }
  0xe4   :  { %1609 = vmatpush1.bf16.msra.mxu1 %v3103_v1 }
  0xe5   :  { %1611 = vmatprep.subr.bf16.mxu1 %v3105_v43 }
  0xe6   :  { %1801 = vmatpush1.bf16.msra.mxu0 %v3104_v62 }
  0xe7   :  { %1803 = vmatprep.subr.bf16.mxu0 %v3106_v10 }
  0xe8   :  { %1613 = vmatpush1.bf16.msra.mxu1 %v3109_v31 }
  0xea   :  { %1805 = vmatpush1.bf16.msra.mxu0 %v3110_v36 }
  0xeb   :  { %841 = vmatmul.mubr.f32.vlgmr.msra.gmra.mrb[0].mxu1 %v3111_v13 }
  0xed   :  { %1384 = vmatmul.mubr.f32.vlgmr.msra.gmra.mrb[0].mxu0 %v3021_v63 }
 0x1be   :  { %v842_v38 = vpop.f32.mrb[0].mxu1 }
 0x1bf   :  { %v844_v21 = vpop.f32.mrb[1].mxu1 }
 0x1c0   :  { %v1385_v56 = vpop.f32.mrb[0].mxu0 }
 0x1c1   :  { %v1806_v5 = vadd.f32 %v1385_v56, %v842_v38  ;;  %v1387_v14 = vpop.f32.mrb[1].mxu0 }
 0x1c2   :  { %v1807_v35 = vadd.f32 %v1387_v14, %v844_v21 }
 0x1c3   :  { %v1390_v26 = vmul.f32 %v1806_v5, %v1806_v5 }
 0x1c4   :  { %v1391_v4 = vmul.f32 %v1807_v35, %v1807_v35 }
 0x1c5   :  { %v1393_v27 = vsel %vm1392_vm0, %v1390_v26, 0.0 }
 0x1c6   :  { %v1394_v40 = vsel %vm1392_vm0, %v1391_v4, 0.0 }
 0x1c7   :  { %v1395_v51 = vadd.f32 %v1394_v40, %v1393_v27 }
 0x1c9   :  { %1396 = vadd.xlane.f32.xlu0 %v1395_v51 }
 0x256   :  { %v1397_v45 = vpop.xlane.xlu0 %1396 }
 0x257   :  { %1822 = vrsqrt.f32 %v1397_v45 }
 0x261   :  { %v1823_v42 = vpop.eup %1822 }
 0x262   :  { %v1399_v6 = vmul.f32 %v1823_v42, %v1806_v5  ;;  %v1400_v63 = vmul.f32 %v1823_v42, %v1807_v35 }
 0x264   :  { %v1403_v41 = vcombine.low %v1399_v6, %v1400_v63 }
 0x266   :  { %1405 = vst [vmem:[#allocation7] sm:$0xff] %v1403_v41 }
 0x267   :  { %1879 = shalt.err (!%p1876_p6)
}
 0x268   :  { %s1880_s10 = scalar_lea.hbm %s2694_s2, 128 }
 0x269   :  { %p1881_p7 = scmp.ne.s32.totalorder %s2694_s2, %s1880_s10  ;;  %p1884_p8 = scmp.lt.u32.totalorder %s1880_s10, %s2694_s2 }
 0x26b   :  { %p1886_p9 = pnand %p1884_p8, %p1881_p7 }
 0x26d   :  { %1889 = shalt.err (!%p1886_p9)
}
 0x26e   :  { %1415 = dma.vmem_to_hbm [thread:$0]  %s1413_s6, 128, %s2694_s2, [#allocation4]  }
 0x26f   :  { %1894 = dma.done.wait [#allocation4], 128  }
 0x270   :  { %1895 = vsyncadd [#allocation4], 4294967168 }
 0x271   :  { %1419 = vsyncpa [#allocation3], 1 }
 0x272   :  { %1420 = vsyncpa [#allocation6], 1 }
 0x273   :  { %1421 = vsyncpa [#allocation4], 1 }

</bundles_post_ra>
